<compile_context>
chip_gen: v5e
topology: v5e:2x2
jax: 0.10.0
libtpu: 0.0.40
codegen_flags: <defaults>
</compile_context>

<pallas_src>
import jax
import jax.numpy as jnp
from jax.experimental import pallas as pl
from jax.experimental.pallas import tpu as pltpu


def attention_flow_kernel(aud_ref, sem_ref, w_ref, bias_ref, out_ref):
    # aud_ref: (Bblk, t, d)   sem_ref: (Bblk, n, d)
    # w_ref:   (3, d) VMEM    bias_ref: (1, 1) f32 SMEM
    # out_ref: (Bblk, t, 4d)
    w = w_ref[...].astype(jnp.float32)            # (3, d)
    w1 = w[0:1, :][None, :, :]                    # (1, 1, d)
    w2 = w[1:2, :][None, :, :]                    # (1, 1, d)
    w3 = w[2:3, :][None, :, :]                    # (1, 1, d)
    bias = bias_ref[0, 0]                         # f32 scalar from SMEM

    # All softmax / elementwise math in f32 (bf16-safe VPU/EUP path on v5e).
    # NOTE: if upstream runs bf16, the einsum operands below could stay bf16
    # (MXU-native on v6e/v7x) with preferred_element_type=f32 accumulation.
    a = aud_ref[...].astype(jnp.float32)          # (B, t, d)
    s = sem_ref[...].astype(jnp.float32)          # (B, n, d)

    # Linear-term contributions: VPU multiply + reduce (no degenerate MXU dots).
    sa = jnp.sum(a * w1, axis=-1, keepdims=True)  # (B, t, 1)
    sb = jnp.sum(s * w2, axis=-1)                 # (B, n)
    sb = sb[:, None, :]                           # (B, 1, n)

    # Cross term on the MXU (batched matmul, f32 accumulation).
    cross = jnp.einsum('btd,bnd->btn', a * w3, s,
                       preferred_element_type=jnp.float32)       # (B, t, n)
    S = cross + sa + sb + bias                                   # (B, t, n)

    # Softmax over n (PyTorch dim=2) -- exact normalization.
    s_max = jnp.max(S, axis=2, keepdims=True)                    # (B, t, 1)
    e = jnp.exp(S - s_max)
    at = e / jnp.sum(e, axis=2, keepdims=True)                   # (B, t, n)

    # bv = softmax over t of per-row maxima (PyTorch dim=1) -- exact normalization.
    rm_max = jnp.max(s_max, axis=1, keepdims=True)               # (B, 1, 1)
    eb = jnp.exp(s_max - rm_max)                                 # (B, t, 1)
    bv = eb / jnp.sum(eb, axis=1, keepdims=True)                 # (B, t, 1)

    # Context vectors.
    # h_con_a2: VPU multiply + sublane reduce (avoids a 1-row MXU dot per batch).
    h_con_a2 = jnp.sum(bv * a, axis=1, keepdims=True)            # (B, 1, d)
    # h_con_w: batched matmul on the MXU.
    h_con_w = jnp.einsum('btn,bnd->btd', at, s,
                         preferred_element_type=jnp.float32)     # (B, t, d)

    # 4d == 128 here -> lane-dense, unmasked store.
    out = jnp.concatenate([a, h_con_w, a * h_con_w, a * h_con_a2], axis=2)
    out_ref[...] = out.astype(out_ref.dtype)


def _num_tensorcores():
    """Best-effort TC-per-chip detection (v7x has 2); default to 1."""
    try:
        kind = jax.devices()[0].device_kind.lower()
        if "v7" in kind or "7x" in kind:
            return 2
    except Exception:
        pass
    return 1


def attention_flow(aud_feats, semantic_feats, weight, bias, *, batch_block=None):
    """aud_feats: (bs, t, d), semantic_feats: (bs, n, d),
    weight: (1, 3d) Linear weight, bias: (1,) Linear bias."""
    bs, t, d = aud_feats.shape
    _, n, _ = semantic_feats.shape
    assert weight.shape == (1, 3 * d)

    # One packed weight operand: rows = [w1, w2, w3]; bias stays as an SMEM scalar.
    w_packed = weight.reshape(3, d)
    bias2d = bias.reshape(1, 1).astype(jnp.float32)

    # Footprint-capped batch block (per-step bytes, double-buffered inputs+output).
    itemsize = jnp.dtype(aud_feats.dtype).itemsize
    per_b_bytes = (t * d + n * d + t * 4 * d) * itemsize
    vmem_budget = 16 * 1024 * 1024                          # safe on v5e/v6e/v7x defaults
    max_block_by_vmem = max(1, vmem_budget // max(1, 2 * per_b_bytes))

    if batch_block is None:
        # Single grid step on 1-TC chips; >=2 steps only when 2 TCs are available.
        n_tc = _num_tensorcores()
        batch_block = max(1, min(bs, max_block_by_vmem, pl.cdiv(bs, n_tc)))
    else:
        batch_block = max(1, min(batch_block, bs, max_block_by_vmem))

    # Pad the batch (instead of shrinking the block) for awkward batch sizes.
    num_steps = pl.cdiv(bs, batch_block)
    padded_bs = num_steps * batch_block
    if padded_bs != bs:
        pad = padded_bs - bs
        aud_in = jnp.pad(aud_feats, ((0, pad), (0, 0), (0, 0)))
        sem_in = jnp.pad(semantic_feats, ((0, pad), (0, 0), (0, 0)))
    else:
        aud_in, sem_in = aud_feats, semantic_feats

    # VMEM limit derived from the actual per-step footprint (generous headroom),
    # capped well below v7x's 64 MiB physical VMEM.
    vmem_limit = int(min(48 * 1024 * 1024,
                         max(8 * 1024 * 1024, 6 * batch_block * per_b_bytes)))

    out = pl.pallas_call(
        attention_flow_kernel,
        out_shape=jax.ShapeDtypeStruct((padded_bs, t, 4 * d), aud_feats.dtype),
        grid_spec=pltpu.PrefetchScalarGridSpec(
            num_scalar_prefetch=0,
            grid=(num_steps,),
            in_specs=[
                pl.BlockSpec((batch_block, t, d), lambda b: (b, 0, 0)),
                pl.BlockSpec((batch_block, n, d), lambda b: (b, 0, 0)),
                pl.BlockSpec((3, d), lambda b: (0, 0)),
                pl.BlockSpec(memory_space=pltpu.MemorySpace.SMEM),
            ],
            out_specs=pl.BlockSpec((batch_block, t, 4 * d), lambda b: (b, 0, 0)),
        ),
        compiler_params=pltpu.CompilerParams(
            dimension_semantics=("parallel",),
            vmem_limit_bytes=vmem_limit,
        ),
    )(aud_in, sem_in, w_packed, bias2d)

    return out[:bs] if padded_bs != bs else out


def attention_flow_reference(aud, sem, weight, bias):
    """Pure-JAX reference matching the PyTorch loop semantics (vectorized)."""
    d = aud.shape[-1]
    w1, w2, w3 = weight[0, :d], weight[0, d:2 * d], weight[0, 2 * d:]
    S = (aud @ w1)[:, :, None] + (sem @ w2)[:, None, :] \
        + jnp.einsum('btd,bnd->btn', aud * w3, sem) + bias[0]
    at = jax.nn.softmax(S, axis=2)
    bv = jax.nn.softmax(jnp.max(S, axis=2), axis=1)
    h_con_a2 = jnp.einsum('bt,btd->bd', bv, aud)[:, None, :]
    h_con_w = jnp.einsum('btn,bnd->btd', at, sem)
    return jnp.concatenate(
        [aud, h_con_w, aud * h_con_w, aud * h_con_a2], axis=2)


if __name__ == "__main__":
    key = jax.random.PRNGKey(0)
    k_aud, k_sem, k_w, k_b = jax.random.split(key, 4)

    # Shapes consistent with the module docstring: t=20 audio steps, n=28 semantic steps.
    bs, t, n, dim = 4, 20, 28, 32

    aud = jax.random.normal(k_aud, (bs, t, dim), dtype=jnp.float32)
    sem = jax.random.normal(k_sem, (bs, n, dim), dtype=jnp.float32)

    # Deterministic synthetic parameters for nn.Linear(dim*3, 1).
    weight = 0.05 * jax.random.normal(k_w, (1, 3 * dim), dtype=jnp.float32)
    bias = 0.1 * jax.random.normal(k_b, (1,), dtype=jnp.float32)

    out = attention_flow(aud, sem, weight, bias)
    out = jax.block_until_ready(out)

    ref = attention_flow_reference(aud, sem, weight, bias)
    assert out.shape == (bs, t, 4 * dim)
    max_err = jnp.max(jnp.abs(out - ref))
    assert jnp.allclose(out, ref, atol=1e-4, rtol=1e-4), \
        f"mismatch vs reference (max |err|={max_err})"

    print("KERNEL_OK")
</pallas_src>

<mosaic_0001>
module attributes {stable_mosaic.version = 11 : i64} {
  func.func @attention_flow_kernel(%arg0: i32, %arg1: memref<4x20x32xf32, #tpu.memory_space<vmem>>, %arg2: memref<4x28x32xf32, #tpu.memory_space<vmem>>, %arg3: memref<3x32xf32, #tpu.memory_space<vmem>>, %arg4: memref<1x1xf32, #tpu.memory_space<smem>>, %arg5: memref<4x20x128xf32, #tpu.memory_space<vmem>>) attributes {dimension_semantics = [#tpu.dimension_semantics<parallel>], iteration_bounds = array<i64: 1>, scalar_prefetch = 0 : i64, scratch_operands = 0 : i64, tpu.core_type = #tpu.core_type<tc>, window_params = [{transform_indices = @transform_0, window_bounds = array<i64: 4, 20, 32>}, {transform_indices = @transform_1, window_bounds = array<i64: 4, 28, 32>}, {pipeline_mode = #tpu.pipeline_mode<synchronous>, transform_indices = @transform_2, window_bounds = array<i64: 3, 32>}, {transform_indices = @transform_3, window_bounds = array<i64: 1, 1>}, {transform_indices = @transform_4, window_bounds = array<i64: 4, 20, 128>}]} {
    %c0 = arith.constant 0 : index
    %c0_0 = arith.constant 0 : index
    %0 = vector.load %arg3[%c0, %c0_0] : memref<3x32xf32, #tpu.memory_space<vmem>>, vector<3x32xf32>
    %1 = vector.extract_strided_slice %0 {offsets = [0, 0], sizes = [1, 32], strides = [1, 1]} : vector<3x32xf32> to vector<1x32xf32>
    %2 = vector.shape_cast %1 : vector<1x32xf32> to vector<1x1x32xf32>
    %3 = vector.extract_strided_slice %0 {offsets = [1, 0], sizes = [1, 32], strides = [1, 1]} : vector<3x32xf32> to vector<1x32xf32>
    %4 = vector.shape_cast %3 : vector<1x32xf32> to vector<1x1x32xf32>
    %5 = vector.extract_strided_slice %0 {offsets = [2, 0], sizes = [1, 32], strides = [1, 1]} : vector<3x32xf32> to vector<1x32xf32>
    %6 = vector.shape_cast %5 : vector<1x32xf32> to vector<1x1x32xf32>
    %c0_1 = arith.constant 0 : index
    %c0_2 = arith.constant 0 : index
    %7 = memref.load %arg4[%c0_1, %c0_2] : memref<1x1xf32, #tpu.memory_space<smem>>
    %c0_3 = arith.constant 0 : index
    %c0_4 = arith.constant 0 : index
    %c0_5 = arith.constant 0 : index
    %8 = vector.load %arg1[%c0_3, %c0_4, %c0_5] : memref<4x20x32xf32, #tpu.memory_space<vmem>>, vector<4x20x32xf32>
    %c0_6 = arith.constant 0 : index
    %c0_7 = arith.constant 0 : index
    %c0_8 = arith.constant 0 : index
    %9 = vector.load %arg2[%c0_6, %c0_7, %c0_8] : memref<4x28x32xf32, #tpu.memory_space<vmem>>, vector<4x28x32xf32>
    %10 = vector.broadcast %2 : vector<1x1x32xf32> to vector<4x20x32xf32>
    %11 = arith.mulf %8, %10 : vector<4x20x32xf32>
    %cst = arith.constant dense<0.000000e+00> : vector<4x20xf32>
    %12 = vector.multi_reduction <add>, %11, %cst [2] : vector<4x20x32xf32> to vector<4x20xf32>
    %13 = vector.shape_cast %12 : vector<4x20xf32> to vector<4x20x1xf32>
    %14 = vector.broadcast %4 : vector<1x1x32xf32> to vector<4x28x32xf32>
    %15 = arith.mulf %9, %14 : vector<4x28x32xf32>
    %cst_9 = arith.constant dense<0.000000e+00> : vector<4x28xf32>
    %16 = vector.multi_reduction <add>, %15, %cst_9 [2] : vector<4x28x32xf32> to vector<4x28xf32>
    %17 = vector.shape_cast %16 : vector<4x28xf32> to vector<4x1x28xf32>
    %18 = vector.broadcast %6 : vector<1x1x32xf32> to vector<4x20x32xf32>
    %19 = arith.mulf %8, %18 : vector<4x20x32xf32>
    "tpu.trace_start"() <{level = 10 : i32, message = "btd,bnd->btn"}> : () -> ()
    %cst_10 = arith.constant dense<0.000000e+00> : vector<4x20x28xf32>
    %20 = tpu.matmul %19, %9, %cst_10 {dimension_numbers = #tpu.dot_dimension_numbers<[2], [2], [1], [1], [0, 0, 0, 1, 1, 1], [0], [0]>} : vector<4x20x32xf32>, vector<4x28x32xf32>, vector<4x20x28xf32> -> vector<4x20x28xf32>
    "tpu.trace_stop"() : () -> ()
    %21 = vector.broadcast %13 : vector<4x20x1xf32> to vector<4x20x28xf32>
    %22 = arith.addf %20, %21 : vector<4x20x28xf32>
    %23 = vector.broadcast %17 : vector<4x1x28xf32> to vector<4x20x28xf32>
    %24 = arith.addf %22, %23 : vector<4x20x28xf32>
    %25 = vector.broadcast %7 : f32 to vector<4x20x28xf32>
    %26 = arith.addf %24, %25 : vector<4x20x28xf32>
    %cst_11 = arith.constant dense<0xFF800000> : vector<4x20xf32>
    %27 = vector.multi_reduction <maximumf>, %26, %cst_11 [2] : vector<4x20x28xf32> to vector<4x20xf32>
    %28 = vector.shape_cast %27 : vector<4x20xf32> to vector<4x20x1xf32>
    %29 = vector.broadcast %28 : vector<4x20x1xf32> to vector<4x20x28xf32>
    %30 = arith.subf %26, %29 : vector<4x20x28xf32>
    %31 = math.exp %30 : vector<4x20x28xf32>
    %cst_12 = arith.constant dense<0.000000e+00> : vector<4x20xf32>
    %32 = vector.multi_reduction <add>, %31, %cst_12 [2] : vector<4x20x28xf32> to vector<4x20xf32>
    %33 = vector.shape_cast %32 : vector<4x20xf32> to vector<4x20x1xf32>
    %34 = vector.broadcast %33 : vector<4x20x1xf32> to vector<4x20x28xf32>
    %35 = arith.divf %31, %34 : vector<4x20x28xf32>
    %cst_13 = arith.constant dense<0xFF800000> : vector<4x1xf32>
    %36 = vector.multi_reduction <maximumf>, %28, %cst_13 [1] : vector<4x20x1xf32> to vector<4x1xf32>
    %37 = vector.shape_cast %36 : vector<4x1xf32> to vector<4x1x1xf32>
    %38 = vector.broadcast %37 : vector<4x1x1xf32> to vector<4x20x1xf32>
    %39 = arith.subf %28, %38 : vector<4x20x1xf32>
    %40 = math.exp %39 : vector<4x20x1xf32>
    %cst_14 = arith.constant dense<0.000000e+00> : vector<4x1xf32>
    %41 = vector.multi_reduction <add>, %40, %cst_14 [1] : vector<4x20x1xf32> to vector<4x1xf32>
    %42 = vector.shape_cast %41 : vector<4x1xf32> to vector<4x1x1xf32>
    %43 = vector.broadcast %42 : vector<4x1x1xf32> to vector<4x20x1xf32>
    %44 = arith.divf %40, %43 : vector<4x20x1xf32>
    %45 = vector.broadcast %44 : vector<4x20x1xf32> to vector<4x20x32xf32>
    %46 = arith.mulf %45, %8 : vector<4x20x32xf32>
    %cst_15 = arith.constant dense<0.000000e+00> : vector<4x32xf32>
    %47 = vector.multi_reduction <add>, %46, %cst_15 [1] : vector<4x20x32xf32> to vector<4x32xf32>
    %48 = vector.shape_cast %47 : vector<4x32xf32> to vector<4x1x32xf32>
    "tpu.trace_start"() <{level = 10 : i32, message = "btn,bnd->btd"}> : () -> ()
    %cst_16 = arith.constant dense<0.000000e+00> : vector<4x20x32xf32>
    %49 = tpu.matmul %35, %9, %cst_16 {dimension_numbers = #tpu.dot_dimension_numbers<[2], [1], [1], [2], [0, 0, 0, 1, 1, 2], [0], [0]>} : vector<4x20x28xf32>, vector<4x28x32xf32>, vector<4x20x32xf32> -> vector<4x20x32xf32>
    "tpu.trace_stop"() : () -> ()
    %50 = arith.mulf %8, %49 : vector<4x20x32xf32>
    %51 = vector.broadcast %48 : vector<4x1x32xf32> to vector<4x20x32xf32>
    %52 = arith.mulf %8, %51 : vector<4x20x32xf32>
    %53 = tpu.concatenate %8, %49, %50, %52 in 2 : vector<4x20x32xf32>, vector<4x20x32xf32>, vector<4x20x32xf32>, vector<4x20x32xf32> -> vector<4x20x128xf32>
    %c0_17 = arith.constant 0 : index
    %c0_18 = arith.constant 0 : index
    %c0_19 = arith.constant 0 : index
    %54 = vector.load %arg5[%c0_17, %c0_18, %c0_19] : memref<4x20x128xf32, #tpu.memory_space<vmem>>, vector<4x20x128xf32>
    tpu.vector_store %arg5[%c0_17, %c0_18, %c0_19], %53 {strides = array<i32>} : memref<4x20x128xf32, #tpu.memory_space<vmem>>, vector<4x20x128xf32>,
    return
  }
  func.func @transform_0(%arg0: i32) -> (i32, i32, i32) {
    %c0_i32 = arith.constant 0 : i32
    %c0_i32_0 = arith.constant 0 : i32
    %c0_i32_1 = arith.constant 0 : i32
    return %arg0, %c0_i32, %c0_i32_0 : i32, i32, i32
  }
  func.func @transform_1(%arg0: i32) -> (i32, i32, i32) {
    %c0_i32 = arith.constant 0 : i32
    %c0_i32_0 = arith.constant 0 : i32
    %c0_i32_1 = arith.constant 0 : i32
    return %arg0, %c0_i32, %c0_i32_0 : i32, i32, i32
  }
  func.func @transform_2(%arg0: i32) -> (i32, i32) {
    %c0_i32 = arith.constant 0 : i32
    %c0_i32_0 = arith.constant 0 : i32
    %c0_i32_1 = arith.constant 0 : i32
    return %c0_i32, %c0_i32_0 : i32, i32
  }
  func.func @transform_3(%arg0: i32) -> (i32, i32) {
    %c0_i32 = arith.constant 0 : i32
    %c0_i32_0 = arith.constant 0 : i32
    %c0_i32_1 = arith.constant 0 : i32
    return %c0_i32, %c0_i32_0 : i32, i32
  }
  func.func @transform_4(%arg0: i32) -> (i32, i32, i32) {
    %c0_i32 = arith.constant 0 : i32
    %c0_i32_0 = arith.constant 0 : i32
    %c0_i32_1 = arith.constant 0 : i32
    return %arg0, %c0_i32, %c0_i32_0 : i32, i32, i32
  }
}

</mosaic_0001>

<bundles_post_ra>
// kernel: tpu_custom_call.1
= control target key start
LH: loop header
LB: loop body
LE: loop exit
PB: predicated region body
PF: predicated region fallthrough
CT: control target
= control target key end

     0   :  { %vm61_vm0 = vcmask 261120   ;;  %vm68_vm1 = vcmask 257024   ;;  %vm386_vm2 = vcmask 130112   ;;  %vm390_vm3 = vcmask 195712   ;;  %s1512_s9 = smov 96   ;;  %s1514_s16 = smov 64   ;;  %s2615_s1 = inlined_call_operand.vmem [shape: f32[4,28,32], index: 1, kind: input, shape index: {}]   ;;  %s2616_s2 = inlined_call_operand.vmem [shape: f32[3,32], index: 2, kind: input, shape index: {}]   ;;  %s2617_s0 = inlined_call_operand.vmem [shape: f32[4,20,32], index: 0, kind: input, shape index: {}]   ;;  %s2618_s3 = inlined_call_operand.<no memory space> [shape: f32[1,1], index: 3, kind: input, shape index: {}]   ;;  %s2619_s4 = inlined_call_operand.vmem [shape: f32[4,20,128], index: 4, kind: output, shape index: {}]  }
   0x1   :  { %v1543_v0 = vld [vmem:[%s2615_s1 + $0x58] sm:$0xf]  ;;  %v1557_v2 = vld [vmem:[%s2615_s1 + $0x50] sm:$0xff]  ;;  %v18_v3 = vld [vmem:[%s2616_s2] sm:$0x7]  ;;  %vm394_vm4 = vcmask 261312  }
   0x2   :  { %v1548_v1 = vld [vmem:[%s2615_s1 + $0x78] sm:$0xf]  ;;  %1387 = vmatpush.xpose.msk.msra.mxu2 %vm61_vm0, %v1543_v0  ;;  %v1565_v4 = vld [vmem:[%s2615_s1 + $0x60] sm:$0xff]  ;;  %v1570_v5 = vld [vmem:[%s2615_s1 + $0x70] sm:$0xff]  ;;  %v1572_v6 = vperm.slane %v18_v3, 1  ;;  %v1630_v22 = vperm.slane %v18_v3, 2 }
   0x3   :  { %1394 = vmatpush.xpose.msk.msra.mxu3 %vm61_vm0, %v1548_v1  ;;  %v1577_v7 = vld [vmem:[%s2615_s1 + $0x40] sm:$0xff]  ;;  %v1582_v8 = vld [vmem:[%s2615_s1 + $0x18] sm:$0xf]  ;;  %v1607_v16 = vld [vmem:[%s2615_s1 + $0x48] sm:$0xff]  ;;  %v1651_v29 = vperm.slane %v18_v3, 0  ;;  %vm480_vm5 = vcmask 228352  }
   0x4   :  { %v112_v9 = vmul.f32 %v1572_v6, %v1565_v4  ;;  %v110_v10 = vmul.f32 %v1572_v6, %v1557_v2  ;;  %v108_v11 = vmul.f32 %v1572_v6, %v1577_v7  ;;  %1373 = vmatpush.xpose.msk.msra.mxu0 %vm61_vm0, %v1582_v8  ;;  %v1595_v12 = vld [vmem:[%s2615_s1 + $0x38] sm:$0xf]  ;;  %v1612_v17 = vld [vmem:[%s2615_s1 + $0x68] sm:$0xff]  ;;  %v1619_v18 = vld [vmem:[%s2615_s1 + $0x10] sm:$0xff]  ;;  %v114_v21 = vmul.f32 %v1572_v6, %v1570_v5 }
   0x5   :  { %1380 = vmatpush.xpose.msk.msra.mxu1 %vm61_vm0, %v1595_v12  ;;  %v1624_v19 = vld [vmem:[%s2615_s1 + $0x30] sm:$0xff]  ;;  %v113_v20 = vmul.f32 %v1572_v6, %v1612_v17  ;;  %v109_v23 = vmul.f32 %v1572_v6, %v1607_v16  ;;  %v29_v25 = vld [vmem:[%s2617_s0 + $0x48] sm:$0xff]  ;;  %v1676_v34 = vld [vmem:[%s2617_s0] sm:$0xff]  ;;  %v115_v36 = vmul.f32 %v1572_v6, %v1548_v1  ;;  %v111_v38 = vmul.f32 %v1572_v6, %v1543_v0 }
   0x6   :  { %1388 = vmatpush.xpose.msk.msra.mxu2 %vm61_vm0, %v1557_v2  ;;  %v152_v13 = vsel %vm61_vm0, %v112_v9, 0.0  ;;  %v146_v14 = vsel %vm61_vm0, %v110_v10, 0.0  ;;  %v140_v15 = vsel %vm61_vm0, %v108_v11, 0.0  ;;  %v26_v24 = vld [vmem:[%s2617_s0 + $0x30] sm:$0xff]  ;;  %v158_v27 = vsel %vm61_vm0, %v114_v21, 0.0  ;;  %v1662_v32 = vld [vmem:[%s2615_s1 + $0x8] sm:$0xff] }
   0x7   :  { %1395 = vmatpush.xpose.msk.msra.mxu3 %vm61_vm0, %v1570_v5  ;;  %153 = vadd.xlane.f32.xlu1 %v152_v13  ;;  %v155_v26 = vsel %vm61_vm0, %v113_v20, 0.0  ;;  %v171_v28 = vmul.f32 %v1630_v22, %v26_v24  ;;  %v143_v30 = vsel %vm61_vm0, %v109_v23, 0.0  ;;  %v174_v31 = vmul.f32 %v1630_v22, %v29_v25  ;;  %v1667_v33 = vld [vmem:[%s2615_s1 + $0x28] sm:$0xff]  ;;  %v1681_v35 = vld [vmem:[%s2617_s0 + $0x18] sm:$0xff]  ;;  %v1693_v39 = vld [vmem:[%s2615_s1] sm:$0xff] }
   0x8   :  { %147 = vadd.xlane.f32.xlu2 %v146_v14  ;;  %141 = vadd.xlane.f32.xlu0 %v140_v15  ;;  %v55_v37 = vmul.f32 %v1651_v29, %v26_v24  ;;  %v1698_v40 = vld [vmem:[%s2615_s1 + $0x20] sm:$0xff]  ;;  %v1703_v41 = vld [vmem:[%s2617_s0 + $0x38] sm:$0xff]  ;;  %v165_v42 = vmul.f32 %v1630_v22, %v1676_v34  ;;  %v168_v43 = vmul.f32 %v1630_v22, %v1681_v35  ;;  %v1716_v44 = vld [vmem:[%s2617_s0 + $0x50] sm:$0xff]  ;;  %v161_v45 = vsel %vm68_vm1, %v115_v36, 0.0 }
   0x9   :  { %1374 = vmatpush.xpose.msk.msra.mxu0 %vm61_vm0, %v1619_v18  ;;  %1381 = vmatpush.xpose.msk.msra.mxu1 %vm61_vm0, %v1624_v19  ;;  %v172_v47 = vmul.f32 %v1630_v22, %v1703_v41  ;;  %v149_v48 = vsel %vm68_vm1, %v111_v38, 0.0  ;;  %v175_v49 = vmul.f32 %v1630_v22, %v1716_v44  ;;  %v1730_v50 = vld [vmem:[%s2617_s0 + $0x8] sm:$0xff]  ;;  %v24_v51 = vld [vmem:[%s2617_s0 + $0x20] sm:$0xff]  ;;  %v100_v52 = vmul.f32 %v1572_v6, %v1693_v39  ;;  %v31_v58 = vld [vmem:[%s2617_s0 + $0x58] sm:$0xf] }
   0xa   :  { %1389 = vmatpush.xpose.msk.msra.mxu2 %vm61_vm0, %v1607_v16  ;;  %v81_v46 = vsel %vm61_vm0, %v55_v37, 0.0  ;;  %v101_v53 = vmul.f32 %v1572_v6, %v1662_v32  ;;  %v58_v54 = vmul.f32 %v1651_v29, %v29_v25  ;;  %v166_v55 = vmul.f32 %v1630_v22, %v1730_v50  ;;  %v1748_v57 = vld [vmem:[%s2617_s0 + $0x40] sm:$0xf]  ;;  %v1764_v3 = vld [vmem:[%s2617_s0 + $0x10] sm:$0xf] }
   0xb   :  { %1396 = vmatpush.xpose.msk.msra.mxu3 %vm61_vm0, %v1612_v17  ;;  %v169_v56 = vmul.f32 %v1630_v22, %v24_v51  ;;  %v116_v59 = vsel %vm61_vm0, %v100_v52, 0.0  ;;  %v173_v61 = vmul.f32 %v1630_v22, %v1748_v57  ;;  %v176_v63 = vmul.f32 %v1630_v22, %v31_v58  ;;  %v1774_v11 = vld [vmem:[%s2617_s0 + $0x28] sm:$0xf] }
   0xc   :  { %v119_v60 = vsel %vm61_vm0, %v101_v53, 0.0  ;;  %v90_v62 = vsel %vm61_vm0, %v58_v54, 0.0  ;;  %v105_v9 = vmul.f32 %v1572_v6, %v1667_v33  ;;  %v102_v10 = vmul.f32 %v1572_v6, %v1619_v18 }
   0xd   :  { %1375 = vmatpush.xpose.msk.msra.mxu0 %vm61_vm0, %v1662_v32  ;;  %1382 = vmatpush.xpose.msk.msra.mxu1 %vm61_vm0, %v1667_v33  ;;  %v104_v13 = vmul.f32 %v1572_v6, %v1698_v40  ;;  %v167_v14 = vmul.f32 %v1630_v22, %v1764_v3  ;;  %v170_v15 = vmul.f32 %v1630_v22, %v1774_v11  ;;  %vm487_vm6 = vcmask 224256  }
   0xe   :  { %1390 = vmatpush.xpose.msk.msra.mxu2 %vm61_vm0, %v1577_v7  ;;  %v131_v20 = vsel %vm61_vm0, %v105_v9, 0.0  ;;  %v122_v21 = vsel %vm61_vm0, %v102_v10, 0.0  ;;  %v103_v24 = vmul.f32 %v1572_v6, %v1582_v8  ;;  %v107_v25 = vmul.f32 %v1572_v6, %v1595_v12 }
   0xf   :  { %1397 = vmatpush.xpose.msk.msra.mxu3 %vm61_vm0, %v1565_v4  ;;  %156 = vadd.xlane.f32.xlu1 %v155_v26  ;;  %v128_v23 = vsel %vm61_vm0, %v104_v13, 0.0  ;;  %v106_v22 = vmul.f32 %v1572_v6, %v1624_v19  ;;  %v49_v36 = vmul.f32 %v1651_v29, %v1676_v34  ;;  %v54_v54 = vmul.f32 %v1651_v29, %v1774_v11 }
  0x10   :  { %159 = vadd.xlane.f32.xlu2 %v158_v27  ;;  %144 = vadd.xlane.f32.xlu0 %v143_v30  ;;  %v125_v26 = vsel %vm68_vm1, %v103_v24, 0.0  ;;  %v137_v27 = vsel %vm68_vm1, %v107_v25, 0.0  ;;  %v56_v30 = vmul.f32 %v1651_v29, %v1703_v41  ;;  %vm771_vm7 = vcmask 1043456  }
  0x11   :  { %1391 = vmatmul.msk.f32.vlgmr.msra.gmra.mxu2 %vm61_vm0, %v171_v28  ;;  %1376 = vmatpush.xpose.msk.msra.mxu0 %vm61_vm0, %v1693_v39  ;;  %v134_v28 = vsel %vm61_vm0, %v106_v22, 0.0  ;;  %v62_v38 = vsel %vm61_vm0, %v49_v36, 0.0 }
  0x12   :  { %1398 = vmatmul.msk.f32.vlgmr.msra.gmra.mxu3 %vm61_vm0, %v174_v31  ;;  %1383 = vmatpush.xpose.msk.msra.mxu1 %vm61_vm0, %v1698_v40  ;;  %v52_v31 = vmul.f32 %v1651_v29, %v1681_v35  ;;  %v84_v6 = vsel %vm61_vm0, %v56_v30, 0.0  ;;  %v59_v35 = vmul.f32 %v1651_v29, %v1716_v44 }
  0x13   :  { %1413 = vmatpush.msk.msrb.mxu3 %vm771_vm7, %v1548_v1  ;;  %1409 = vmatpush.msk.msrb.mxu2 %vm771_vm7, %v1543_v0 }
  0x14   :  { %1377 = vmatmul.msk.f32.vlgmr.msra.gmra.mxu0 %vm61_vm0, %v165_v42  ;;  %v72_v37 = vsel %vm61_vm0, %v52_v31, 0.0  ;;  %v53_v42 = vmul.f32 %v1651_v29, %v24_v51  ;;  %v57_v51 = vmul.f32 %v1651_v29, %v1748_v57 }
  0x15   :  { %1384 = vmatmul.msk.f32.vlgmr.msra.gmra.mxu1 %vm61_vm0, %v168_v43  ;;  %v50_v43 = vmul.f32 %v1651_v29, %v1730_v50  ;;  %1401 = vmatpush.msk.msrb.mxu0 %vm771_vm7, %v1582_v8 }
  0x16   :  { %v87_v53 = vsel %vm68_vm1, %v57_v51, 0.0  ;;  %1405 = vmatpush.msk.msrb.mxu1 %vm771_vm7, %v1595_v12  ;;  %1138 = vmatpush.msrb.mxu3 %v1570_v5 }
  0x17   :  { %162 = vadd.xlane.f32.xlu1 %v161_v45  ;;  %v75_v45 = vsel %vm61_vm0, %v53_v42, 0.0  ;;  %1027 = vmatpush.msrb.mxu0 %v1619_v18 }
  0x18   :  { %82 = vadd.xlane.f32.xlu2 %v81_v46  ;;  %150 = vadd.xlane.f32.xlu0 %v149_v48  ;;  %v65_v46 = vsel %vm61_vm0, %v50_v43, 0.0  ;;  %v51_v48 = vmul.f32 %v1651_v29, %v1764_v3 }
  0x19   :  { %1392 = vmatmul.msk.f32.gmra.mxu2 %vm61_vm0, %v172_v47  ;;  %v93_v47 = vsel %vm61_vm0, %v59_v35, 0.0  ;;  %1064 = vmatpush.msrb.mxu1 %v1624_v19 }
  0x1a   :  { %1399 = vmatmul.msk.f32.gmra.mxu3 %vm61_vm0, %v175_v49  ;;  %v60_v49 = vmul.f32 %v1651_v29, %v31_v58  ;;  %v69_v52 = vsel %vm68_vm1, %v51_v48, 0.0  ;;  %1101 = vmatpush.msrb.mxu2 %v1557_v2 }
  0x1b   :  { %1139 = vmatpush.msrb.mxu3 %v1612_v17  ;;  %1028 = vmatpush.msrb.mxu0 %v1662_v32 }
  0x1c   :  { %1378 = vmatmul.msk.f32.gmra.mxu0 %vm61_vm0, %v166_v55  ;;  %v96_v44 = vsel %vm68_vm1, %v60_v49, 0.0  ;;  %v78_v55 = vsel %vm68_vm1, %v54_v54, 0.0  ;;  %1065 = vmatpush.msrb.mxu1 %v1667_v33 }
  0x1d   :  { %1385 = vmatmul.msk.f32.gmra.mxu1 %vm61_vm0, %v169_v56  ;;  %1102 = vmatpush.msrb.mxu2 %v1607_v16 }
  0x1e   :  { %1140 = vmatpush.msrb.mxu3 %v1565_v4  ;;  %1029 = vmatpush.msrb.mxu0 %v1693_v39 }
  0x1f   :  { %117 = vadd.xlane.f32.xlu1 %v116_v59  ;;  %1066 = vmatpush.msrb.mxu1 %v1698_v40 }
  0x20   :  { %120 = vadd.xlane.f32.xlu2 %v119_v60  ;;  %91 = vadd.xlane.f32.xlu0 %v90_v62 }
  0x21   :  { %1393 = vmatmul.msk.f32.gmra.mxu2 %vm61_vm0, %v173_v61 }
  0x22   :  { %1400 = vmatmul.msk.f32.gmra.mxu3 %vm61_vm0, %v176_v63  ;;  %v381_v63 = vlaneseq  ;;  %1103 = vmatpush.msrb.mxu2 %v1577_v7 }
  0x24   :  { %1379 = vmatmul.msk.f32.gmra.mxu0 %vm61_vm0, %v167_v14  ;;  %v382_v9 = vand.u32 127, %v381_v63 }
  0x25   :  { %1386 = vmatmul.msk.f32.gmra.mxu1 %vm61_vm0, %v170_v15 }
  0x26   :  { %v384_v10 = vadd.s32 4294967288, %v382_v9  ;;  %v388_v29 = vadd.s32 4294967280, %v382_v9 }
  0x27   :  { %132 = vadd.xlane.f32.xlu1 %v131_v20 }
  0x28   :  { %123 = vadd.xlane.f32.xlu2 %v122_v21  ;;  %129 = vadd.xlane.f32.xlu0 %v128_v23  ;;  %v1827_v21 = vadd.s32 4294967272, %v382_v9 }
  0x2f   :  { %126 = vadd.xlane.f32.xlu1 %v125_v26 }
  0x30   :  { %138 = vadd.xlane.f32.xlu2 %v137_v27  ;;  %135 = vadd.xlane.f32.xlu0 %v134_v28 }
  0x37   :  { %73 = vadd.xlane.f32.xlu1 %v72_v37  ;;  %v1838_v37 = vstv %s2618_s3 }
  0x38   :  { %85 = vadd.xlane.f32.xlu2 %v84_v6  ;;  %63 = vadd.xlane.f32.xlu0 %v62_v38 }
  0x3f   :  { %66 = vadd.xlane.f32.xlu1 %v65_v46 }
  0x40   :  { %76 = vadd.xlane.f32.xlu2 %v75_v45  ;;  %94 = vadd.xlane.f32.xlu0 %v93_v47 }
  0x47   :  { %97 = vadd.xlane.f32.xlu1 %v96_v44 }
  0x48   :  { %70 = vadd.xlane.f32.xlu2 %v69_v52  ;;  %88 = vadd.xlane.f32.xlu0 %v87_v53 }
  0x50   :  { %79 = vadd.xlane.f32.xlu0 %v78_v55 }
  0x7a   :  { %v154_v56 = vpop.xlane.xlu1 %153 }
  0x7b   :  { %v1825_v58 = vpop.xlane.xlu2 %147  ;;  %v142_v59 = vpop.xlane.xlu0 %141  ;;  %v410_v23 = vperm.slane %v154_v56, %v382_v9 }
  0x7c   :  { %v403_v55 = vperm.slane %v142_v59, %v382_v9 }
  0x82   :  { %v157_v60 = vpop.xlane.xlu1 %156 }
  0x83   :  { %v160_v61 = vpop.xlane.xlu2 %159  ;;  %v145_v62 = vpop.xlane.xlu0 %144  ;;  %v411_v20 = vperm.slane %v157_v60, %v384_v10 }
  0x84   :  { %v413_v24 = vperm.slane %v160_v61, %v388_v29  ;;  %v404_v51 = vperm.slane %v145_v62, %v384_v10  ;;  %v406_v62 = vperm.slane %v1825_v58, %v388_v29 }
  0x85   :  { %v412_v25 = vsel %vm386_vm2, %v411_v20, %v410_v23 }
  0x86   :  { %v414_v31 = vsel %vm390_vm3, %v413_v24, %v412_v25  ;;  %v405_v61 = vsel %vm386_vm2, %v404_v51, %v403_v55 }
  0x8a   :  { %v163_v13 = vpop.xlane.xlu1 %162 }
  0x8b   :  { %v83_v14 = vpop.xlane.xlu2 %82  ;;  %v151_v15 = vpop.xlane.xlu0 %150  ;;  %v415_v22 = vperm.slane %v163_v13, %v1827_v21 }
  0x8c   :  { %v408_v20 = vperm.slane %v151_v15, %v1827_v21 }
  0x8d   :  { %v1833_v6 = vsel %vm394_vm4, %v415_v22, %v414_v31 }
  0x91   :  { %v215_v54 = vpop.f32.mrf.mxu0 }
  0x92   :  { %v118_v26 = vpop.xlane.xlu1 %117  ;;  %v262_v60 = vpop.f32.mrf.mxu1 }
  0x93   :  { %v121_v27 = vpop.xlane.xlu2 %120  ;;  %v92_v28 = vpop.xlane.xlu0 %91  ;;  %v383_v63 = vperm.slane %v118_v26, %v382_v9 }
  0x94   :  { %v309_v47 = vpop.f32.mrf.mxu2  ;;  %v385_v13 = vperm.slane %v121_v27, %v384_v10 }
  0x95   :  { %v356_v30 = vpop.f32.mrf.mxu3 }
  0x96   :  { %v357_v36 = vadd.f32 %v356_v30, %v92_v28 }
  0x98   :  { %v464_v38 = vadd.f32 %v1833_v6, %v357_v36  ;;  %v387_v36 = vsel %vm386_vm2, %v385_v13, %v383_v63 }
  0x9a   :  { %v1842_v42 = vadd.f32 %v1838_v37, %v464_v38  ;;  %v133_v43 = vpop.xlane.xlu1 %132 }
  0x9b   :  { %v124_v35 = vpop.xlane.xlu2 %123  ;;  %v130_v45 = vpop.xlane.xlu0 %129  ;;  %v397_v44 = vperm.slane %v133_v43, %v384_v10 }
  0x9c   :  { %v509_v46 = vsel %vm480_vm5, %v1842_v42, -inf  ;;  %v396_v53 = vperm.slane %v130_v45, %v382_v9  ;;  %v389_v24 = vperm.slane %v124_v35, %v388_v29  ;;  %v312_v22 = vpop.f32.mrf.mxu2  ;;  %v407_v9 = vsel %vm390_vm3, %v406_v62, %v405_v61 }
  0x9d   :  { %510 = vmax.xlane.f32.xlu2 %v509_v46  ;;  %v409_v27 = vsel %vm394_vm4, %v408_v20, %v407_v9 }
  0x9e   :  { %v398_v23 = vsel %vm386_vm2, %v397_v44, %v396_v53  ;;  %v391_v38 = vsel %vm390_vm3, %v389_v24, %v387_v36  ;;  %v265_v44 = vpop.f32.mrf.mxu1 }
  0xa2   :  { %v127_v48 = vpop.xlane.xlu1 %126 }
  0xa3   :  { %v139_v49 = vpop.xlane.xlu2 %138  ;;  %v136_v52 = vpop.xlane.xlu0 %135  ;;  %v393_v28 = vperm.slane %v127_v48, %v1827_v21 }
  0xa4   :  { %v399_v56 = vperm.slane %v136_v52, %v388_v29  ;;  %v401_v25 = vperm.slane %v139_v49, %v1827_v21  ;;  %v310_v21 = vadd.f32 %v309_v47, %v83_v14  ;;  %v218_v48 = vpop.f32.mrf.mxu0  ;;  %v359_v49 = vpop.f32.mrf.mxu3 }
  0xa5   :  { %v395_v45 = vsel %vm394_vm4, %v393_v28, %v391_v38 }
  0xa6   :  { %v400_v59 = vsel %vm390_vm3, %v399_v56, %v398_v23 }
  0xa7   :  { %v1858_v43 = vsel %vm394_vm4, %v401_v25, %v400_v59 }
  0xaa   :  { %v74_v31 = vpop.xlane.xlu1 %73 }
  0xab   :  { %v86_v30 = vpop.xlane.xlu2 %85  ;;  %v263_v15 = vadd.f32 %v262_v60, %v74_v31  ;;  %v64_v26 = vpop.xlane.xlu0 %63 }
  0xac   :  { %v313_v10 = vadd.f32 %v312_v22, %v86_v30  ;;  %v216_v58 = vadd.f32 %v215_v54, %v64_v26  ;;  %v461_v54 = vadd.f32 %v409_v27, %v310_v21  ;;  %v221_v62 = vpop.f32.mrf.mxu0  ;;  %v315_v30 = vpop.f32.mrf.mxu2 }
  0xad   :  { %v458_v35 = vadd.f32 %v1858_v43, %v263_v15  ;;  %v362_v31 = vpop.f32.mrf.mxu3 }
  0xae   :  { %v462_v29 = vadd.f32 %v409_v27, %v313_v10  ;;  %v455_v46 = vadd.f32 %v395_v45, %v216_v58  ;;  %v1879_v24 = vadd.f32 %v1838_v37, %v461_v54 }
  0xaf   :  { %v1866_v52 = vadd.f32 %v1838_v37, %v458_v35 }
  0xb0   :  { %v1863_v51 = vadd.f32 %v1838_v37, %v462_v29  ;;  %v1869_v53 = vadd.f32 %v1838_v37, %v455_v46  ;;  %v500_v9 = vsel %vm480_vm5, %v1879_v24, -inf }
  0xb1   :  { %v491_v47 = vsel %vm480_vm5, %v1866_v52, -inf }
  0xb2   :  { %v503_v14 = vsel %vm480_vm5, %v1863_v51, -inf  ;;  %492 = vmax.xlane.f32.xlu1 %v491_v47  ;;  %v67_v56 = vpop.xlane.xlu1 %66  ;;  %v481_v60 = vsel %vm480_vm5, %v1869_v53, -inf }
  0xb3   :  { %v77_v55 = vpop.xlane.xlu2 %76  ;;  %504 = vmax.xlane.f32.xlu2 %v503_v14  ;;  %482 = vmax.xlane.f32.xlu0 %v481_v60  ;;  %v95_v63 = vpop.xlane.xlu0 %94  ;;  %v219_v23 = vadd.f32 %v218_v48, %v67_v56 }
  0xb4   :  { %v266_v61 = vadd.f32 %v265_v44, %v77_v55  ;;  %v360_v13 = vadd.f32 %v359_v49, %v95_v63  ;;  %v268_v14 = vpop.f32.mrf.mxu1 }
  0xb5   :  { %v456_v59 = vadd.f32 %v395_v45, %v219_v23 }
  0xb6   :  { %v459_v20 = vadd.f32 %v1858_v43, %v266_v61  ;;  %v465_v25 = vadd.f32 %v1833_v6, %v360_v13 }
  0xb7   :  { %v1895_v46 = vadd.f32 %v1838_v37, %v456_v59 }
  0xb8   :  { %v1883_v22 = vadd.f32 %v1838_v37, %v459_v20  ;;  %v1886_v28 = vadd.f32 %v1838_v37, %v465_v25 }
  0xba   :  { %v494_v36 = vsel %vm480_vm5, %v1883_v22, -inf  ;;  %501 = vmax.xlane.f32.xlu1 %v500_v9  ;;  %v98_v15 = vpop.xlane.xlu1 %97  ;;  %v512_v26 = vsel %vm480_vm5, %v1886_v28, -inf }
  0xbb   :  { %495 = vmax.xlane.f32.xlu2 %v494_v36  ;;  %v71_v10 = vpop.xlane.xlu2 %70  ;;  %513 = vmax.xlane.f32.xlu0 %v512_v26  ;;  %v89_v58 = vpop.xlane.xlu0 %88  ;;  %v363_v29 = vadd.f32 %v362_v31, %v98_v15 }
  0xbc   :  { %v222_v38 = vadd.f32 %v221_v62, %v71_v10  ;;  %v316_v21 = vadd.f32 %v315_v30, %v89_v58 }
  0xbd   :  { %v466_v54 = vadd.f32 %v1833_v6, %v363_v29 }
  0xbe   :  { %v457_v35 = vadd.f32 %v395_v45, %v222_v38  ;;  %v463_v48 = vadd.f32 %v409_v27, %v316_v21  ;;  %v484_v45 = vsel %vm480_vm5, %v1895_v46, -inf }
  0xbf   :  { %v1911_v60 = vadd.f32 %v1838_v37, %v466_v54 }
  0xc0   :  { %v1898_v49 = vadd.f32 %v1838_v37, %v457_v35  ;;  %v1901_v44 = vadd.f32 %v1838_v37, %v463_v48 }
  0xc1   :  { %v515_v63 = vsel %vm487_vm6, %v1911_v60, -inf }
  0xc2   :  { %v488_v47 = vsel %vm487_vm6, %v1898_v49, -inf  ;;  %485 = vmax.xlane.f32.xlu1 %v484_v45  ;;  %v506_v27 = vsel %vm487_vm6, %v1901_v44, -inf }
  0xc3   :  { %489 = vmax.xlane.f32.xlu2 %v488_v47  ;;  %507 = vmax.xlane.f32.xlu0 %v506_v27  ;;  %v80_v55 = vpop.xlane.xlu0 %79 }
  0xc4   :  { %v269_v56 = vadd.f32 %v268_v14, %v80_v55 }
  0xc6   :  { %v460_v6 = vadd.f32 %v1858_v43, %v269_v56 }
  0xc8   :  { %v1915_v61 = vadd.f32 %v1838_v37, %v460_v6 }
  0xca   :  { %516 = vmax.xlane.f32.xlu1 %v515_v63  ;;  %v497_v13 = vsel %vm487_vm6, %v1915_v61, -inf }
  0xcb   :  { %498 = vmax.xlane.f32.xlu0 %v497_v13 }
 0x110   :  { %v1921_v20 = vpop.xlane.xlu2 %510 }
 0x111   :  { %v527_v23 = vsub.f32 %v1842_v42, %v1921_v20 }
 0x113   :  { %v548_v25 = vmul.f32 1.442695, %v527_v23 }
 0x115   :  { %1420 = vpow2.f32 %v548_v25 }
 0x11b   :  { %v1939_v1 = vpop.eup %1420 }
 0x11c   :  { %v581_v0 = vsel %vm480_vm5, %v1939_v1, 0.0 }
 0x11d   :  { %582 = vadd.xlane.f32.xlu2 %v581_v0 }
 0x125   :  { %v1951_v5 = vpop.xlane.xlu1 %492 }
 0x126   :  { %v1949_v2 = vpop.xlane.xlu2 %504  ;;  %v521_v12 = vsub.f32 %v1866_v52, %v1951_v5  ;;  %v1957_v16 = vpop.xlane.xlu0 %482 }
 0x127   :  { %v525_v8 = vsub.f32 %v1863_v51, %v1949_v2  ;;  %v518_v4 = vsub.f32 %v1869_v53, %v1957_v16 }
 0x128   :  { %v536_v18 = vmul.f32 1.442695, %v521_v12 }
 0x129   :  { %v544_v17 = vmul.f32 1.442695, %v525_v8  ;;  %v530_v19 = vmul.f32 1.442695, %v518_v4 }
 0x12b   :  { %1422 = vpow2.f32 %v544_v17 }
 0x12c   :  { %1424 = vpow2.f32 %v536_v18 }
 0x12d   :  { %1426 = vpow2.f32 %v530_v19  ;;  %v1963_v32 = vpop.xlane.xlu1 %501 }
 0x12e   :  { %v1961_v7 = vpop.xlane.xlu2 %495  ;;  %v524_v39 = vsub.f32 %v1879_v24, %v1963_v32  ;;  %v1969_v40 = vpop.xlane.xlu0 %513  ;;  %v789_v30 = vmax.f32 %v1963_v32, %v1949_v2 }
 0x12f   :  { %v522_v33 = vsub.f32 %v1883_v22, %v1961_v7  ;;  %v528_v37 = vsub.f32 %v1886_v28, %v1969_v40  ;;  %v798_v42 = vmax.f32 %v1921_v20, %v1969_v40  ;;  %v780_v13 = vmax.f32 %v1951_v5, %v1961_v7 }
 0x130   :  { %v542_v52 = vmul.f32 1.442695, %v524_v39 }
 0x131   :  { %v1975_v43 = vpop.eup %1422  ;;  %v538_v51 = vmul.f32 1.442695, %v522_v33  ;;  %v550_v62 = vmul.f32 1.442695, %v528_v37 }
 0x132   :  { %v1977_v53 = vpop.eup %1424  ;;  %v575_v22 = vsel %vm480_vm5, %v1975_v43, 0.0 }
 0x133   :  { %v1981_v59 = vpop.eup %1426  ;;  %1428 = vpow2.f32 %v538_v51  ;;  %576 = vadd.xlane.f32.xlu2 %v575_v22  ;;  %v563_v24 = vsel %vm480_vm5, %v1977_v53, 0.0 }
 0x134   :  { %1430 = vpow2.f32 %v542_v52  ;;  %564 = vadd.xlane.f32.xlu1 %v563_v24  ;;  %v554_v28 = vsel %vm480_vm5, %v1981_v59, 0.0 }
 0x135   :  { %1432 = vpow2.f32 %v550_v62  ;;  %555 = vadd.xlane.f32.xlu0 %v554_v28  ;;  %v1991_v36 = vpop.xlane.xlu1 %485 }
 0x136   :  { %v1989_v31 = vpop.xlane.xlu2 %489  ;;  %v519_v15 = vsub.f32 %v1895_v46, %v1991_v36  ;;  %v770_v26 = vmax.f32 %v1957_v16, %v1991_v36  ;;  %v2001_v38 = vpop.xlane.xlu0 %507 }
 0x137   :  { %v520_v9 = vsub.f32 %v1898_v49, %v1989_v31  ;;  %v772_v10 = vsel %vm771_vm7, %v1989_v31, -inf  ;;  %v526_v58 = vsub.f32 %v1901_v44, %v2001_v38  ;;  %v790_v21 = vsel %vm771_vm7, %v2001_v38, -inf }
 0x138   :  { %v532_v48 = vmul.f32 1.442695, %v519_v15  ;;  %v773_v49 = vmax.f32 %v770_v26, %v772_v10  ;;  %v791_v54 = vmax.f32 %v789_v30, %v790_v21 }
 0x139   :  { %v2007_v29 = vpop.eup %1428  ;;  %v534_v35 = vmul.f32 1.442695, %v520_v9  ;;  %v546_v46 = vmul.f32 1.442695, %v526_v58 }
 0x13a   :  { %v2009_v14 = vpop.eup %1430  ;;  %v566_v47 = vsel %vm480_vm5, %v2007_v29, 0.0  ;;  %v774_v27 = vrot.slane %v773_v49, 4  ;;  %v792_v44 = vrot.slane %v791_v54, 4 }
 0x13b   :  { %v2013_v45 = vpop.eup %1432  ;;  %1434 = vpow2.f32 %v534_v35  ;;  %567 = vadd.xlane.f32.xlu2 %v566_v47  ;;  %v572_v55 = vsel %vm480_vm5, %v2009_v14, 0.0 }
 0x13c   :  { %1436 = vpow2.f32 %v532_v48  ;;  %573 = vadd.xlane.f32.xlu1 %v572_v55  ;;  %v584_v56 = vsel %vm480_vm5, %v2013_v45, 0.0  ;;  %v775_v6 = vmax.f32 %v773_v49, %v774_v27  ;;  %v793_v63 = vmax.f32 %v791_v54, %v792_v44 }
 0x13d   :  { %1438 = vpow2.f32 %v546_v46  ;;  %585 = vadd.xlane.f32.xlu0 %v584_v56  ;;  %v2021_v23 = vpop.xlane.xlu1 %516 }
 0x13e   :  { %v776_v25 = vrot.slane %v775_v6, 2  ;;  %v794_v0 = vrot.slane %v793_v63, 2  ;;  %v529_v8 = vsub.f32 %v1911_v60, %v2021_v23  ;;  %v799_v12 = vsel %vm771_vm7, %v2021_v23, -inf  ;;  %v2027_v4 = vpop.xlane.xlu0 %498 }
 0x13f   :  { %v800_v17 = vmax.f32 %v798_v42, %v799_v12  ;;  %v523_v18 = vsub.f32 %v1915_v61, %v2027_v4  ;;  %v781_v19 = vsel %vm771_vm7, %v2027_v4, -inf }
 0x140   :  { %v777_v39 = vmax.f32 %v775_v6, %v776_v25  ;;  %v795_v37 = vmax.f32 %v793_v63, %v794_v0  ;;  %v552_v51 = vmul.f32 1.442695, %v529_v8  ;;  %v782_v52 = vmax.f32 %v780_v13, %v781_v19 }
 0x141   :  { %v2033_v33 = vpop.eup %1434  ;;  %v801_v60 = vrot.slane %v800_v17, 4  ;;  %v540_v22 = vmul.f32 1.442695, %v523_v18 }
 0x142   :  { %v2035_v62 = vpop.eup %1436  ;;  %v560_v24 = vsel %vm487_vm6, %v2033_v33, 0.0  ;;  %v778_v28 = vrot.slane %v777_v39, 1  ;;  %v796_v61 = vrot.slane %v795_v37, 1  ;;  %1440 = vpow2.f32 %v552_v51 }
 0x143   :  { %v2039_v42 = vpop.eup %1438  ;;  %v783_v30 = vrot.slane %v782_v52, 4  ;;  %561 = vadd.xlane.f32.xlu2 %v560_v24  ;;  %v802_v9 = vmax.f32 %v800_v17, %v801_v60  ;;  %1442 = vpow2.f32 %v540_v22  ;;  %v557_v10 = vsel %vm480_vm5, %v2035_v62, 0.0 }
 0x144   :  { %v578_v15 = vsel %vm487_vm6, %v2039_v42, 0.0  ;;  %v779_v26 = vmax.f32 %v777_v39, %v778_v28  ;;  %v797_v58 = vmax.f32 %v795_v37, %v796_v61  ;;  %558 = vadd.xlane.f32.xlu1 %v557_v10 }
 0x145   :  { %v784_v21 = vmax.f32 %v782_v52, %v783_v30  ;;  %579 = vadd.xlane.f32.xlu0 %v578_v15  ;;  %v803_v35 = vrot.slane %v802_v9, 2 }
 0x146   :  { %v807_v48 = vsub.f32 %v1957_v16, %v779_v26  ;;  %v808_v49 = vsub.f32 %v1991_v36, %v779_v26  ;;  %v809_v54 = vsub.f32 %v1989_v31, %v779_v26  ;;  %v813_v46 = vsub.f32 %v1963_v32, %v797_v58 }
 0x147   :  { %v814_v47 = vsub.f32 %v1949_v2, %v797_v58  ;;  %v815_v27 = vsub.f32 %v2001_v38, %v797_v58  ;;  %v804_v44 = vmax.f32 %v802_v9, %v803_v35  ;;  %v785_v55 = vrot.slane %v784_v21, 2 }
 0x148   :  { %v2051_v56 = vpop.eup %1440  ;;  %v819_v6 = vmul.f32 1.442695, %v807_v48  ;;  %v821_v63 = vmul.f32 1.442695, %v808_v49  ;;  %v823_v13 = vmul.f32 1.442695, %v809_v54 }
 0x149   :  { %v2053_v25 = vpop.eup %1442  ;;  %v831_v16 = vmul.f32 1.442695, %v813_v46  ;;  %v833_v0 = vmul.f32 1.442695, %v814_v47  ;;  %v786_v36 = vmax.f32 %v784_v21, %v785_v55  ;;  %v805_v31 = vrot.slane %v804_v44, 1 }
 0x14a   :  { %1444 = vpow2.f32 %v819_v6  ;;  %v587_v32 = vsel %vm487_vm6, %v2051_v56, 0.0  ;;  %v569_v2 = vsel %vm487_vm6, %v2053_v25, 0.0  ;;  %v835_v38 = vmul.f32 1.442695, %v815_v27 }
 0x14b   :  { %1446 = vpow2.f32 %v821_v63  ;;  %v787_v8 = vrot.slane %v786_v36, 1  ;;  %v806_v12 = vmax.f32 %v804_v44, %v805_v31 }
 0x14c   :  { %1448 = vpow2.f32 %v823_v13  ;;  %588 = vadd.xlane.f32.xlu1 %v587_v32 }
 0x14d   :  { %570 = vadd.xlane.f32.xlu0 %v569_v2  ;;  %1450 = vpow2.f32 %v831_v16  ;;  %v788_v17 = vmax.f32 %v786_v36, %v787_v8  ;;  %v816_v18 = vsub.f32 %v1921_v20, %v806_v12  ;;  %v817_v19 = vsub.f32 %v1969_v40, %v806_v12 }
 0x14e   :  { %1452 = vpow2.f32 %v833_v0  ;;  %v818_v39 = vsub.f32 %v2021_v23, %v806_v12 }
 0x14f   :  { %1454 = vpow2.f32 %v835_v38  ;;  %v810_v37 = vsub.f32 %v1951_v5, %v788_v17  ;;  %v811_v51 = vsub.f32 %v1961_v7, %v788_v17  ;;  %v812_v52 = vsub.f32 %v2027_v4, %v788_v17 }
 0x150   :  { %v2065_v60 = vpop.eup %1444  ;;  %v837_v22 = vmul.f32 1.442695, %v816_v18  ;;  %v839_v24 = vmul.f32 1.442695, %v817_v19  ;;  %v841_v28 = vmul.f32 1.442695, %v818_v39 }
 0x151   :  { %v2067_v61 = vpop.eup %1446  ;;  %v825_v30 = vmul.f32 1.442695, %v810_v37  ;;  %v827_v23 = vmul.f32 1.442695, %v811_v51  ;;  %v829_v4 = vmul.f32 1.442695, %v812_v52 }
 0x152   :  { %v2069_v20 = vpop.eup %1448  ;;  %v843_v40 = vadd.f32 %v2067_v61, %v2065_v60  ;;  %1456 = vpow2.f32 %v837_v22 }
 0x153   :  { %v2073_v5 = vpop.eup %1450  ;;  %v844_v7 = vsel %vm771_vm7, %v2069_v20, 0.0  ;;  %1458 = vpow2.f32 %v839_v24 }
 0x154   :  { %v2077_v9 = vpop.eup %1452  ;;  %v845_v10 = vadd.f32 %v844_v7, %v843_v40  ;;  %1460 = vpow2.f32 %v841_v28 }
 0x155   :  { %v2079_v15 = vpop.eup %1454  ;;  %v861_v26 = vadd.f32 %v2077_v9, %v2073_v5  ;;  %1462 = vpow2.f32 %v825_v30 }
 0x156   :  { %v846_v58 = vrot.slane %v845_v10, 4  ;;  %v862_v21 = vsel %vm771_vm7, %v2079_v15, 0.0  ;;  %1464 = vpow2.f32 %v827_v23 }
 0x157   :  { %v863_v35 = vadd.f32 %v862_v21, %v861_v26  ;;  %1466 = vpow2.f32 %v829_v4 }
 0x158   :  { %v2085_v48 = vpop.eup %1456  ;;  %v847_v49 = vadd.f32 %v846_v58, %v845_v10 }
 0x159   :  { %v2087_v54 = vpop.eup %1458  ;;  %v864_v46 = vrot.slane %v863_v35, 4 }
 0x15a   :  { %v2089_v47 = vpop.eup %1460  ;;  %v848_v27 = vrot.slane %v847_v49, 2  ;;  %v870_v44 = vadd.f32 %v2087_v54, %v2085_v48 }
 0x15b   :  { %v2093_v55 = vpop.eup %1462  ;;  %v865_v6 = vadd.f32 %v864_v46, %v863_v35  ;;  %v871_v63 = vsel %vm771_vm7, %v2089_v47, 0.0 }
 0x15c   :  { %v2097_v13 = vpop.eup %1464  ;;  %v849_v16 = vadd.f32 %v848_v27, %v847_v49  ;;  %v872_v0 = vadd.f32 %v871_v63, %v870_v44 }
 0x15d   :  { %v2099_v36 = vpop.eup %1466  ;;  %v866_v31 = vrot.slane %v865_v6, 2  ;;  %v852_v32 = vadd.f32 %v2097_v13, %v2093_v55 }
 0x15e   :  { %v850_v2 = vrot.slane %v849_v16, 1  ;;  %v873_v38 = vrot.slane %v872_v0, 4  ;;  %v853_v8 = vsel %vm771_vm7, %v2099_v36, 0.0 }
 0x15f   :  { %v867_v12 = vadd.f32 %v866_v31, %v865_v6  ;;  %v854_v17 = vadd.f32 %v853_v8, %v852_v32 }
 0x160   :  { %v851_v18 = vadd.f32 %v850_v2, %v849_v16  ;;  %v874_v19 = vadd.f32 %v873_v38, %v872_v0 }
 0x161   :  { %v868_v39 = vrot.slane %v867_v12, 1  ;;  %v855_v37 = vrot.slane %v854_v17, 4 }
 0x162   :  { %1468 = vrcp.f32 %v851_v18  ;;  %v875_v52 = vrot.slane %v874_v19, 2  ;;  %v888_v21 = vand.u32 2147483647, %v851_v18  ;;  %v890_v35 = vand.u32 2147483648, %v851_v18 }
 0x163   :  { %v869_v51 = vadd.f32 %v868_v39, %v867_v12  ;;  %v856_v22 = vadd.f32 %v855_v37, %v854_v17  ;;  %vm884_vm9 = vweird.f32 %v851_v18 }
 0x164   :  { %v876_v24 = vadd.f32 %v875_v52, %v874_v19  ;;  %v891_v0 = vor.u32 1.1754944e-38, %v890_v35  ;;  %vm889_vm12 = vcmp.eq.f32.partialorder %v888_v21, 8.507059e+37 }
 0x165   :  { %1470 = vrcp.f32 %v869_v51  ;;  %v857_v28 = vrot.slane %v856_v22, 2  ;;  %v922_v27 = vand.u32 2147483647, %v869_v51  ;;  %v924_v63 = vand.u32 2147483648, %v869_v51 }
 0x166   :  { %v877_v40 = vrot.slane %v876_v24, 1  ;;  %vm918_vm13 = vweird.f32 %v869_v51 }
 0x167   :  { %v858_v23 = vadd.f32 %v857_v28, %v856_v22  ;;  %vm2112_vm14 = vcmp.eq.f32.partialorder %v922_v27, 8.507059e+37  ;;  %v925_v19 = vor.u32 1.1754944e-38, %v924_v63 }
 0x168   :  { %v1469_v30 = vpop.eup %1468  ;;  %v2105_v4 = vadd.f32 %v877_v40, %v876_v24 }
 0x169   :  { %v880_v7 = vmul.f32 %v1469_v30, %v851_v18  ;;  %v859_v10 = vrot.slane %v858_v23, 1  ;;  %vm885_vm8 = vweird.f32 %v1469_v30 }
 0x16a   :  { %1472 = vrcp.f32 %v2105_v4  ;;  %vm886_vm10 = vmor %vm884_vm9, %vm885_vm8  ;;  %v941_v32 = vand.u32 2147483648, %v2105_v4  ;;  %vm935_vm15 = vweird.f32 %v2105_v4  ;;  %v939_v22 = vand.u32 2147483647, %v2105_v4 }
 0x16b   :  { %v1471_v26 = vpop.eup %1470  ;;  %v881_v58 = vsub.f32 1.0, %v880_v7  ;;  %v2108_v44 = vadd.f32 %v859_v10, %v858_v23 }
 0x16c   :  { %v914_v49 = vmul.f32 %v1471_v26, %v869_v51  ;;  %vm919_vm11 = vweird.f32 %v1471_v26  ;;  %v942_v24 = vor.u32 1.1754944e-38, %v941_v32  ;;  %vm940_vm7 = vcmp.eq.f32.partialorder %v939_v22, 8.507059e+37 }
 0x16d   :  { %v882_v46 = vmul.f32 %v1469_v30, %v881_v58  ;;  %1474 = vrcp.f32 %v2108_v44  ;;  %vm920_vm2 = vmor %vm918_vm13, %vm919_vm11  ;;  %v905_v28 = vand.u32 2147483647, %v2108_v44  ;;  %vm901_vm8 = vweird.f32 %v2108_v44 }
 0x16e   :  { %v915_v6 = vsub.f32 1.0, %v914_v49 }
 0x16f   :  { %v883_v16 = vadd.f32 %v1469_v30, %v882_v46 }
 0x170   :  { %v916_v31 = vmul.f32 %v1471_v26, %v915_v6  ;;  %v1473_v8 = vpop.eup %1472 }
 0x171   :  { %v887_v2 = vsel %vm886_vm10, %v1469_v30, %v883_v16  ;;  %v931_v52 = vmul.f32 %v1473_v8, %v2105_v4  ;;  %vm936_vm3 = vweird.f32 %v1473_v8  ;;  %vm906_vm10 = vcmp.eq.f32.partialorder %v905_v28, 8.507059e+37 }
 0x172   :  { %v892_v12 = vsel %vm889_vm12, %v891_v0, %v887_v2  ;;  %v917_v17 = vadd.f32 %v1471_v26, %v916_v31  ;;  %vm937_vm6 = vmor %vm935_vm15, %vm936_vm3 }
 0x173   :  { %v893_v18 = vmul.f32 %v2065_v60, %v892_v12  ;;  %v894_v39 = vmul.f32 %v2067_v61, %v892_v12  ;;  %v895_v37 = vmul.f32 %v2069_v20, %v892_v12  ;;  %v1475_v30 = vpop.eup %1474  ;;  %v932_v61 = vsub.f32 1.0, %v931_v52 }
 0x174   :  { %v921_v51 = vsel %vm920_vm2, %v1471_v26, %v917_v17  ;;  %v897_v26 = vmul.f32 %v1475_v30, %v2108_v44  ;;  %vm902_vm4 = vweird.f32 %v1475_v30 }
 0x175   :  { %v947_v40 = vmul.f32 %v893_v18, %v1676_v34  ;;  %v948_v23 = vmul.f32 %v894_v39, %v1730_v50  ;;  %v926_v60 = vsel %vm2112_vm14, %v925_v19, %v921_v51  ;;  %v933_v21 = vmul.f32 %v1473_v8, %v932_v61  ;;  %v2136_v50 = vld [vmem:[%s2617_s0 + $0x30] sm:$0xff]  ;;  %vm903_vm9 = vmor %vm901_vm8, %vm902_vm4  ;;  %v2157_v18 = vld [vmem:[%s2617_s0 + $0x48] sm:$0xff] }
 0x176   :  { %v927_v20 = vmul.f32 %v2073_v5, %v926_v60  ;;  %v928_v7 = vmul.f32 %v2077_v9, %v926_v60  ;;  %v929_v10 = vmul.f32 %v2079_v15, %v926_v60  ;;  %v949_v34 = vmul.f32 %v895_v37, %v1764_v3  ;;  %v2180_v60 = vld [vmem:[%s2617_s0 + $0x18] sm:$0xff] }
 0x177   :  { %v960_v58 = vsel %vm61_vm0, %v948_v23, 0.0  ;;  %v898_v9 = vsub.f32 1.0, %v897_v26  ;;  %v907_v15 = vand.u32 2147483648, %v2108_v44  ;;  %v934_v46 = vadd.f32 %v1473_v8, %v933_v21 }
 0x178   :  { %v953_v35 = vmul.f32 %v2136_v50, %v927_v20  ;;  %v954_v5 = vmul.f32 %v928_v7, %v1703_v41  ;;  %v955_v49 = vmul.f32 %v929_v10, %v1748_v57  ;;  %v959_v27 = vsel %vm61_vm0, %v947_v40, 0.0 }
 0x179   :  { %v899_v3 = vmul.f32 %v1475_v30, %v898_v9  ;;  %v961_v6 = vadd.f32 %v960_v58, %v959_v27  ;;  %v938_v0 = vsel %vm937_vm6, %v1473_v8, %v934_v46  ;;  %v962_v41 = vsel %vm68_vm1, %v949_v34, 0.0 }
 0x17a   :  { %v981_v63 = vsel %vm61_vm0, %v953_v35, 0.0  ;;  %v982_v16 = vsel %vm61_vm0, %v954_v5, 0.0  ;;  %v943_v57 = vsel %vm940_vm7, %v942_v24, %v938_v0  ;;  %v908_v32 = vor.u32 1.1754944e-38, %v907_v15  ;;  %v2211_v0 = vld [vmem:[%s2617_s0 + $0x10] sm:$0xf] }
 0x17b   :  { %v900_v31 = vadd.f32 %v1475_v30, %v899_v3  ;;  %v963_v2 = vadd.f32 %v962_v41, %v961_v6  ;;  %v944_v38 = vmul.f32 %v2085_v48, %v943_v57  ;;  %v945_v4 = vmul.f32 %v2087_v54, %v943_v57  ;;  %v2163_v48 = vld [vmem:[%s2617_s0 + $0x50] sm:$0xff]  ;;  %v2199_v3 = vld [vmem:[%s2617_s0 + $0x8] sm:$0xff] }
 0x17c   :  { %v946_v12 = vmul.f32 %v2089_v47, %v943_v57  ;;  %v983_v17 = vadd.f32 %v982_v16, %v981_v63  ;;  %v984_v44 = vsel %vm68_vm1, %v955_v49, 0.0  ;;  %v2169_v47 = vld [vmem:[%s2617_s0 + $0x58] sm:$0xf]  ;;  %v2205_v63 = vld [vmem:[%s2617_s0] sm:$0xff] }
 0x17d   :  { %v904_v19 = vsel %vm903_vm9, %v1475_v30, %v900_v31  ;;  %v964_v8 = vrot.slane %v963_v2, 4  ;;  %v956_v39 = vmul.f32 %v2157_v18, %v944_v38  ;;  %v957_v54 = vmul.f32 %v2163_v48, %v945_v4 }
 0x17e   :  { %v958_v37 = vmul.f32 %v2169_v47, %v946_v12  ;;  %v909_v52 = vsel %vm906_vm10, %v908_v32, %v904_v19  ;;  %v985_v30 = vadd.f32 %v984_v44, %v983_v17  ;;  %v2222_v44 = vld [vmem:[%s2617_s0 + $0x28] sm:$0xf] }
 0x17f   :  { %v910_v51 = vmul.f32 %v2093_v55, %v909_v52  ;;  %v911_v22 = vmul.f32 %v2097_v13, %v909_v52  ;;  %v912_v24 = vmul.f32 %v2099_v36, %v909_v52  ;;  %v965_v28 = vadd.f32 %v964_v8, %v963_v2  ;;  %v2186_v55 = vld [vmem:[%s2617_s0 + $0x20] sm:$0xff] }
 0x180   :  { %v992_v40 = vsel %vm61_vm0, %v956_v39, 0.0  ;;  %v993_v23 = vsel %vm61_vm0, %v957_v54, 0.0  ;;  %v995_v21 = vsel %vm68_vm1, %v958_v37, 0.0  ;;  %v986_v35 = vrot.slane %v985_v30, 4 }
 0x181   :  { %v950_v61 = vmul.f32 %v2180_v60, %v910_v51  ;;  %v951_v13 = vmul.f32 %v2186_v55, %v911_v22  ;;  %v952_v36 = vmul.f32 %v912_v24, %v1774_v11  ;;  %v966_v20 = vrot.slane %v965_v28, 2 }
 0x182   :  { %v994_v7 = vadd.f32 %v993_v23, %v992_v40  ;;  %v987_v11 = vadd.f32 %v986_v35, %v985_v30  ;;  %v2231_v23 = vld [vmem:[%s2617_s0 + $0x38] sm:$0xff] }
 0x183   :  { %v967_v10 = vadd.f32 %v966_v20, %v965_v28  ;;  %v970_v26 = vsel %vm61_vm0, %v950_v61, 0.0  ;;  %v971_v58 = vsel %vm61_vm0, %v951_v13, 0.0  ;;  %v973_v15 = vsel %vm68_vm1, %v952_v36, 0.0  ;;  %v2238_v20 = vld [vmem:[%s2617_s0 + $0x40] sm:$0xf]  ;;  %s1513_s0 = smov 32  }
 0x184   :  { %v972_v34 = vadd.f32 %v971_v58, %v970_v26  ;;  %v2193_v5 = vadd.f32 %v995_v21, %v994_v7  ;;  %v988_v32 = vrot.slane %v987_v11, 2 }
 0x185   :  { %v968_v9 = vrot.slane %v967_v10, 1 }
 0x186   :  { %v974_v49 = vadd.f32 %v973_v15, %v972_v34  ;;  %v989_v12 = vadd.f32 %v988_v32, %v987_v11 }
 0x187   :  { %v969_v46 = vadd.f32 %v968_v9, %v967_v10 }
 0x188   :  { %v975_v27 = vrot.slane %v974_v49, 4  ;;  %v990_v54 = vrot.slane %v989_v12, 1 }
 0x189   :  { %v1164_v6 = vmul.f32 %v2199_v3, %v969_v46  ;;  %v1163_v16 = vmul.f32 %v2205_v63, %v969_v46  ;;  %v1165_v41 = vmul.f32 %v2211_v0, %v969_v46 }
 0x18a   :  { %v976_v57 = vadd.f32 %v975_v27, %v974_v49  ;;  %v991_v22 = vadd.f32 %v990_v54, %v989_v12 }
 0x18b   :  { %1285 = vrot.lane.b32.xlu1 %v1164_v6, %s1512_s9  ;;  %1283 = vrot.lane.b32.xlu2 %v1163_v16, %s1512_s9 }
 0x18c   :  { %1287 = vrot.lane.b32.xlu0 %v1165_v41, %s1512_s9  ;;  %v977_v31 = vrot.slane %v976_v57, 2  ;;  %v1170_v61 = vmul.f32 %v2231_v23, %v991_v22  ;;  %v1169_v13 = vmul.f32 %v2136_v50, %v991_v22  ;;  %v1171_v7 = vmul.f32 %v2238_v20, %v991_v22 }
 0x18e   :  { %v978_v38 = vadd.f32 %v977_v31, %v976_v57 }
 0x190   :  { %v583_v2 = vpop.xlane.xlu2 %582  ;;  %v979_v4 = vrot.slane %v978_v38, 1 }
 0x191   :  { %1476 = vrcp.f32 %v583_v2  ;;  %v736_v24 = vand.u32 2147483648, %v583_v2  ;;  %v734_v30 = vand.u32 2147483647, %v583_v2  ;;  %vm730_vm11 = vweird.f32 %v583_v2 }
 0x192   :  { %v980_v17 = vadd.f32 %v979_v4, %v978_v38 }
 0x193   :  { %v737_v36 = vor.u32 1.1754944e-38, %v736_v24  ;;  %vm735_vm13 = vcmp.eq.f32.partialorder %v734_v30, 8.507059e+37 }
 0x194   :  { %v1167_v19 = vmul.f32 %v2186_v55, %v980_v17  ;;  %v1166_v8 = vmul.f32 %v2180_v60, %v980_v17  ;;  %v1168_v39 = vmul.f32 %v2222_v44, %v980_v17 }
 0x196   :  { %1291 = vrot.lane.b32.xlu1 %v1167_v19, %s1512_s9  ;;  %1289 = vrot.lane.b32.xlu2 %v1166_v8, %s1512_s9 }
 0x197   :  { %v1477_v37 = vpop.eup %1476  ;;  %1293 = vrot.lane.b32.xlu0 %v1168_v39, %s1512_s9 }
 0x198   :  { %v726_v52 = vmul.f32 %v1477_v37, %v583_v2  ;;  %vm731_vm1 = vweird.f32 %v1477_v37 }
 0x199   :  { %vm732_vm12 = vmor %vm730_vm11, %vm731_vm1 }
 0x19a   :  { %v727_v51 = vsub.f32 1.0, %v726_v52 }
 0x19c   :  { %v728_v28 = vmul.f32 %v1477_v37, %v727_v51 }
 0x19e   :  { %v729_v40 = vadd.f32 %v1477_v37, %v728_v28  ;;  %1297 = vrot.lane.b32.xlu1 %v1170_v61, %s1512_s9  ;;  %1295 = vrot.lane.b32.xlu2 %v1169_v13, %s1512_s9 }
 0x19f   :  { %1299 = vrot.lane.b32.xlu0 %v1171_v7, %s1512_s9 }
 0x1a0   :  { %v733_v10 = vsel %vm732_vm12, %v1477_v37, %v729_v40 }
 0x1a1   :  { %v738_v26 = vsel %vm735_vm13, %v737_v36, %v733_v10 }
 0x1a2   :  { %v739_v58 = vmul.f32 %v1939_v1, %v738_v26 }
 0x1a4   :  { %1414 = vmatmul.msk.f32.vlgmr.msrb.gmra.mxu3 %vm480_vm5, %v739_v58 }
 0x1a6   :  { %v2246_v21 = vpop.xlane.xlu2 %576 }
 0x1a7   :  { %1478 = vrcp.f32 %v2246_v21  ;;  %v565_v34 = vpop.xlane.xlu1 %564  ;;  %v706_v49 = vand.u32 2147483648, %v2246_v21  ;;  %v704_v31 = vand.u32 2147483647, %v2246_v21  ;;  %vm700_vm11 = vweird.f32 %v2246_v21 }
 0x1a8   :  { %1480 = vrcp.f32 %v565_v34  ;;  %v556_v35 = vpop.xlane.xlu0 %555  ;;  %v644_v16 = vand.u32 2147483647, %v565_v34  ;;  %v646_v2 = vand.u32 2147483648, %v565_v34  ;;  %vm640_vm14 = vweird.f32 %v565_v34 }
 0x1a9   :  { %1482 = vrcp.f32 %v556_v35  ;;  %v599_v38 = vand.u32 2147483647, %v556_v35  ;;  %v2269_v4 = vor.u32 1.1754944e-38, %v706_v49  ;;  %v601_v17 = vand.u32 2147483648, %v556_v35 }
 0x1aa   :  { %vm595_vm15 = vweird.f32 %v556_v35  ;;  %vm2273_vm2 = vcmp.eq.f32.partialorder %v644_v16, 8.507059e+37  ;;  %v647_v22 = vor.u32 1.1754944e-38, %v646_v2 }
 0x1ab   :  { %vm2284_vm6 = vcmp.eq.f32.partialorder %v599_v38, 8.507059e+37  ;;  %v602_v30 = vor.u32 1.1754944e-38, %v601_v17 }
 0x1ad   :  { %v2249_v9 = vpop.eup %1478 }
 0x1ae   :  { %v2251_v15 = vpop.eup %1480  ;;  %v2254_v46 = vpop.xlane.xlu2 %567  ;;  %v696_v1 = vmul.f32 %v2249_v9, %v2246_v21  ;;  %vm701_vm10 = vweird.f32 %v2249_v9 }
 0x1af   :  { %v2256_v27 = vpop.eup %1482  ;;  %v636_v11 = vmul.f32 %v2251_v15, %v565_v34  ;;  %1484 = vrcp.f32 %v2254_v46  ;;  %v2262_v6 = vpop.xlane.xlu1 %573  ;;  %v661_v37 = vand.u32 2147483648, %v2254_v46  ;;  %vm641_vm4 = vweird.f32 %v2251_v15 }
 0x1b0   :  { %v591_v41 = vmul.f32 %v2256_v27, %v556_v35  ;;  %v2265_v57 = vpop.xlane.xlu0 %585  ;;  %1486 = vrcp.f32 %v2262_v6  ;;  %v697_v19 = vsub.f32 1.0, %v696_v1  ;;  %vm596_vm3 = vweird.f32 %v2256_v27  ;;  %vm2309_vm1 = vmor %vm640_vm14, %vm641_vm4 }
 0x1b1   :  { %v637_v32 = vsub.f32 1.0, %v636_v11  ;;  %1488 = vrcp.f32 %v2265_v57  ;;  %vm655_vm7 = vweird.f32 %v2254_v46  ;;  %vm2298_vm8 = vmor %vm595_vm15, %vm596_vm3  ;;  %vm685_vm9 = vweird.f32 %v2262_v6 }
 0x1b2   :  { %v592_v12 = vsub.f32 1.0, %v591_v41  ;;  %v698_v36 = vmul.f32 %v2249_v9, %v697_v19  ;;  %v689_v10 = vand.u32 2147483647, %v2262_v6  ;;  %v662_v35 = vor.u32 1.1754944e-38, %v661_v37 }
 0x1b3   :  { %v638_v8 = vmul.f32 %v2251_v15, %v637_v32  ;;  %v691_v34 = vand.u32 2147483648, %v2262_v6  ;;  %v751_v32 = vand.u32 2147483648, %v2265_v57  ;;  %vm745_vm14 = vweird.f32 %v2265_v57 }
 0x1b4   :  { %v593_v54 = vmul.f32 %v2256_v27, %v592_v12  ;;  %vm2335_vm12 = vcmp.eq.f32.partialorder %v689_v10, 8.507059e+37  ;;  %v749_v39 = vand.u32 2147483647, %v2265_v57  ;;  %vm2370_vm3 = vcmp.eq.f32.partialorder %v704_v31, 8.507059e+37 }
 0x1b5   :  { %v2280_v52 = vpop.eup %1484  ;;  %v639_v51 = vadd.f32 %v2251_v15, %v638_v8  ;;  %v692_v24 = vor.u32 1.1754944e-38, %v691_v34 }
 0x1b6   :  { %v594_v28 = vadd.f32 %v2256_v27, %v593_v54  ;;  %v651_v40 = vmul.f32 %v2280_v52, %v2254_v46  ;;  %v2292_v61 = vpop.xlane.xlu2 %561  ;;  %v2294_v13 = vpop.eup %1486  ;;  %vm656_vm13 = vweird.f32 %v2280_v52 }
 0x1b7   :  { %1490 = vrcp.f32 %v2292_v61  ;;  %v681_v49 = vmul.f32 %v2294_v13, %v2262_v6  ;;  %v2315_v1 = vpop.xlane.xlu1 %558  ;;  %v2322_v41 = vpop.eup %1488  ;;  %v643_v2 = vsel %vm2309_vm1, %v2251_v15, %v639_v51  ;;  %v631_v19 = vand.u32 2147483648, %v2292_v61 }
 0x1b8   :  { %v652_v58 = vsub.f32 1.0, %v651_v40  ;;  %v2317_v11 = vpop.xlane.xlu0 %579  ;;  %v598_v16 = vsel %vm2298_vm8, %v2256_v27, %v594_v28  ;;  %1492 = vrcp.f32 %v2315_v1  ;;  %v741_v27 = vmul.f32 %v2322_v41, %v2265_v57 }
 0x1b9   :  { %v682_v12 = vsub.f32 1.0, %v681_v49  ;;  %1494 = vrcp.f32 %v2317_v11  ;;  %v603_v8 = vsel %vm2284_vm6, %v602_v30, %v598_v16  ;;  %v659_v15 = vand.u32 2147483647, %v2254_v46 }
 0x1ba   :  { %v653_v38 = vmul.f32 %v2280_v52, %v652_v58  ;;  %v742_v37 = vsub.f32 1.0, %v741_v27  ;;  %v604_v51 = vmul.f32 %v1981_v59, %v603_v8  ;;  %v648_v28 = vsel %vm2273_vm2, %v647_v22, %v643_v2  ;;  %vm2362_vm2 = vmor %vm655_vm7, %vm656_vm13 }
 0x1bb   :  { %v683_v54 = vmul.f32 %v2294_v13, %v682_v12  ;;  %vm686_vm15 = vweird.f32 %v2294_v13  ;;  %v649_v30 = vmul.f32 %v1977_v53, %v648_v28  ;;  %v699_v53 = vadd.f32 %v2249_v9, %v698_v36 }
 0x1bc   :  { %v654_v7 = vadd.f32 %v2280_v52, %v653_v38  ;;  %1402 = vmatmul.msk.f32.vlgmr.msrb.gmra.mxu0 %vm480_vm5, %v604_v51  ;;  %v752_v49 = vor.u32 1.1754944e-38, %v751_v32  ;;  %v2374_v16 = vor.u32 1.1754944e-38, %v631_v19  ;;  %vm660_vm4 = vcmp.eq.f32.partialorder %v659_v15, 8.507059e+37  ;;  %vm2386_vm6 = vmor %vm685_vm9, %vm686_vm15 }
 0x1bd   :  { %v2349_v40 = vpop.eup %1490  ;;  %v684_v10 = vadd.f32 %v2294_v13, %v683_v54  ;;  %1406 = vmatmul.msk.f32.vlgmr.msrb.gmra.mxu1 %vm480_vm5, %v649_v30  ;;  %v743_v36 = vmul.f32 %v2322_v41, %v742_v37  ;;  %v616_v27 = vand.u32 2147483648, %v2315_v1  ;;  %vm625_vm7 = vweird.f32 %v2292_v61  ;;  %vm2411_vm9 = vmor %vm700_vm11, %vm701_vm10 }
 0x1be   :  { %v621_v26 = vmul.f32 %v2349_v40, %v2292_v61  ;;  %v1493_v58 = vpop.eup %1492  ;;  %v658_v46 = vsel %vm2362_vm2, %v2280_v52, %v654_v7  ;;  %vm746_vm8 = vweird.f32 %v2322_v41  ;;  %v703_v51 = vsel %vm2411_vm9, %v2249_v9, %v699_v53 }
 0x1bf   :  { %v2380_v34 = vpop.eup %1494  ;;  %v606_v2 = vmul.f32 %v1493_v58, %v2315_v1  ;;  %v2392_v38 = vpop.xlane.xlu1 %588  ;;  %v663_v52 = vsel %vm660_vm4, %v662_v35, %v658_v46  ;;  %v688_v6 = vsel %vm2386_vm6, %v2294_v13, %v684_v10  ;;  %v614_v35 = vand.u32 2147483647, %v2315_v1  ;;  %vm747_vm13 = vmor %vm745_vm14, %vm746_vm8 }
 0x1c0   :  { %v622_v32 = vsub.f32 1.0, %v621_v26  ;;  %v2394_v12 = vpop.xlane.xlu0 %570  ;;  %v711_v19 = vmul.f32 %v2380_v34, %v2317_v11  ;;  %1496 = vrcp.f32 %v2392_v38  ;;  %v664_v37 = vmul.f32 %v2007_v29, %v663_v52 }
 0x1c1   :  { %v607_v8 = vsub.f32 1.0, %v606_v2  ;;  %1498 = vrcp.f32 %v2394_v12  ;;  %v693_v30 = vsel %vm2335_vm12, %v692_v24, %v688_v6  ;;  %v744_v7 = vadd.f32 %v2322_v41, %v743_v36 }
 0x1c2   :  { %v623_v54 = vmul.f32 %v2349_v40, %v622_v32  ;;  %v712_v13 = vsub.f32 1.0, %v711_v19  ;;  %vm611_vm1 = vweird.f32 %v1493_v58  ;;  %vm610_vm10 = vweird.f32 %v2315_v1 }
 0x1c3   :  { %v608_v28 = vmul.f32 %v1493_v58, %v607_v8  ;;  %v617_v21 = vor.u32 1.1754944e-38, %v616_v27  ;;  %vm715_vm11 = vweird.f32 %v2317_v11  ;;  %v694_v10 = vmul.f32 %v2009_v14, %v693_v30  ;;  %vm612_vm15 = vmor %vm610_vm10, %vm611_vm1 }
 0x1c4   :  { %v713_v29 = vmul.f32 %v2380_v34, %v712_v13  ;;  %v748_v9 = vsel %vm747_vm13, %v2322_v41, %v744_v7  ;;  %vm750_vm12 = vcmp.eq.f32.partialorder %v749_v39, 8.507059e+37  ;;  %vm615_vm2 = vcmp.eq.f32.partialorder %v614_v35, 8.507059e+37 }
 0x1c5   :  { %v609_v17 = vadd.f32 %v1493_v58, %v608_v28  ;;  %1407 = vmatmul.msk.f32.gmra.mxu1 %vm480_vm5, %v664_v37  ;;  %1410 = vmatmul.msk.f32.vlgmr.msrb.gmra.mxu2 %vm480_vm5, %v694_v10  ;;  %v753_v1 = vsel %vm750_vm12, %v752_v49, %v748_v9  ;;  %v708_v14 = vsel %vm2370_vm3, %v2269_v4, %v703_v51  ;;  %vm626_vm14 = vweird.f32 %v2349_v40 }
 0x1c6   :  { %v1497_v24 = vpop.eup %1496  ;;  %v624_v57 = vadd.f32 %v2349_v40, %v623_v54  ;;  %v754_v41 = vmul.f32 %v2013_v45, %v753_v1  ;;  %v721_v53 = vand.u32 2147483648, %v2317_v11  ;;  %v766_v49 = vand.u32 2147483648, %v2392_v38  ;;  %vm2451_vm3 = vmor %vm625_vm7, %vm626_vm14 }
 0x1c7   :  { %v1499_v26 = vpop.eup %1498  ;;  %v756_v59 = vmul.f32 %v1497_v24, %v2392_v38  ;;  %v613_v39 = vsel %vm612_vm15, %v1493_v58, %v609_v17  ;;  %v676_v4 = vand.u32 2147483648, %v2394_v12  ;;  %v629_v32 = vand.u32 2147483647, %v2292_v61 }
 0x1c8   :  { %v666_v46 = vmul.f32 %v1499_v26, %v2394_v12  ;;  %v618_v31 = vsel %vm615_vm2, %v617_v21, %v613_v39  ;;  %1415 = vmatmul.msk.f32.gmra.mxu3 %vm480_vm5, %v754_v41  ;;  %v709_v58 = vmul.f32 %v1975_v43, %v708_v14  ;;  %v674_v52 = vand.u32 2147483647, %v2394_v12 }
 0x1c9   :  { %v757_v36 = vsub.f32 1.0, %v756_v59  ;;  %v619_v22 = vmul.f32 %v2035_v62, %v618_v31  ;;  %v714_v27 = vadd.f32 %v2380_v34, %v713_v29  ;;  %v628_v62 = vsel %vm2451_vm3, %v2349_v40, %v624_v57 }
 0x1ca   :  { %v667_v45 = vsub.f32 1.0, %v666_v46  ;;  %vm716_vm4 = vweird.f32 %v2380_v34  ;;  %vm761_vm6 = vweird.f32 %v1497_v24  ;;  %vm671_vm8 = vweird.f32 %v1499_v26 }
 0x1cb   :  { %v758_v19 = vmul.f32 %v1497_v24, %v757_v36  ;;  %1403 = vmatmul.msk.f32.gmra.mxu0 %vm480_vm5, %v619_v22  ;;  %v719_v61 = vand.u32 2147483647, %v2317_v11  ;;  %v764_v6 = vand.u32 2147483647, %v2392_v38  ;;  %vm760_vm7 = vweird.f32 %v2392_v38  ;;  %vm2468_vm10 = vmor %vm715_vm11, %vm716_vm4 }
 0x1cc   :  { %v668_v43 = vmul.f32 %v1499_v26, %v667_v45  ;;  %vm670_vm9 = vweird.f32 %v2394_v12  ;;  %vm630_vm1 = vcmp.eq.f32.partialorder %v629_v32, 8.507059e+37  ;;  %v767_v35 = vor.u32 1.1754944e-38, %v766_v49  ;;  %vm762_vm13 = vmor %vm760_vm7, %vm761_vm6 }
 0x1cd   :  { %v759_v40 = vadd.f32 %v1497_v24, %v758_v19  ;;  %1411 = vmatmul.msk.f32.gmra.mxu2 %vm480_vm5, %v709_v58  ;;  %v633_v15 = vsel %vm630_vm1, %v2374_v16, %v628_v62  ;;  %v718_v38 = vsel %vm2468_vm10, %v2380_v34, %v714_v27  ;;  %v722_v12 = vor.u32 1.1754944e-38, %v721_v53  ;;  %vm672_vm11 = vmor %vm670_vm9, %vm671_vm8 }
 0x1ce   :  { %v669_v54 = vadd.f32 %v1499_v26, %v668_v43  ;;  %v677_v13 = vor.u32 1.1754944e-38, %v676_v4  ;;  %vm765_vm12 = vcmp.eq.f32.partialorder %v764_v6, 8.507059e+37  ;;  %vm675_vm15 = vcmp.eq.f32.partialorder %v674_v52, 8.507059e+37 }
 0x1cf   :  { %v763_v11 = vsel %vm762_vm13, %v1497_v24, %v759_v40  ;;  %vm720_vm2 = vcmp.eq.f32.partialorder %v719_v61, 8.507059e+37  ;;  %v634_v28 = vmul.f32 %v2033_v33, %v633_v15  ;;  %v997_v41 = vrot.slane %v2193_v5, 4 }
 0x1d0   :  { %v673_v37 = vsel %vm672_vm11, %v1499_v26, %v669_v54  ;;  %v768_v51 = vsel %vm765_vm12, %v767_v35, %v763_v11  ;;  %v723_v30 = vsel %vm720_vm2, %v722_v12, %v718_v38  ;;  %vm1344_vm14 = vcmask 785408  }
 0x1d1   :  { %v678_v16 = vsel %vm675_vm15, %v677_v13, %v673_v37  ;;  %v769_v7 = vmul.f32 %v2051_v56, %v768_v51  ;;  %v724_v21 = vmul.f32 %v2039_v42, %v723_v30  ;;  %v998_v53 = vadd.f32 %v997_v41, %v2193_v5 }
 0x1d2   :  { %v679_v34 = vmul.f32 %v2053_v25, %v678_v16 }
 0x1d3   :  { %1404 = vmatmul.msk.f32.gmra.mxu0 %vm480_vm5, %v634_v28  ;;  %1416 = vmatmul.msk.f32.gmra.mxu3 %vm480_vm5, %v769_v7  ;;  %v999_v36 = vrot.slane %v998_v53, 2 }
 0x1d4   :  { %1408 = vmatmul.msk.f32.gmra.mxu1 %vm480_vm5, %v679_v34 }
 0x1d5   :  { %1412 = vmatmul.msk.f32.gmra.mxu2 %vm480_vm5, %v724_v21  ;;  %v1000_v4 = vadd.f32 %v999_v36, %v998_v53  ;;  %vm1331_vm5 = vcmask 523264  }
 0x1d7   :  { %v1001_v45 = vrot.slane %v1000_v4, 1 }
 0x1d9   :  { %v1002_v58 = vadd.f32 %v1001_v45, %v1000_v4 }
 0x1db   :  { %v1172_v27 = vmul.f32 %v2157_v18, %v1002_v58  ;;  %v1173_v19 = vmul.f32 %v2163_v48, %v1002_v58  ;;  %v1174_v8 = vmul.f32 %v2169_v47, %v1002_v58 }
 0x1e5   :  { %v1284_v52 = vpop.permute.xlu2 %1283 }
 0x1f0   :  { %v1290_v43 = vpop.permute.xlu2 %1289 }
 0x1f8   :  { %v1296_v6 = vpop.permute.xlu2 %1295 }
 0x1fd   :  { %v1286_v40 = vpop.permute.xlu1 %1285 }
 0x1fe   :  { %v1288_v11 = vpop.permute.xlu0 %1287 }
 0x208   :  { %v1292_v15 = vpop.permute.xlu1 %1291 }
 0x210   :  { %v1298_v38 = vpop.permute.xlu1 %1297 }
 0x227   :  { %v1142_v57 = vpop.f32.mrf.mxu3 }
 0x228   :  { %v1160_v32 = vmul.f32 %v2157_v18, %v1142_v57 }
 0x239   :  { %v1031_v10 = vpop.f32.mrf.mxu0 }
 0x23a   :  { %v1068_v29 = vpop.f32.mrf.mxu1  ;;  %1187 = vrot.lane.b32.xlu1 %v1031_v10, %s1513_s0  ;;  %v1151_v33 = vmul.f32 %v2205_v63, %v1031_v10 }
 0x23b   :  { %1193 = vrot.lane.b32.xlu2 %v1068_v29, %s1513_s0  ;;  %v1154_v9 = vmul.f32 %v2180_v60, %v1068_v29 }
 0x242   :  { %v1071_v56 = vpop.f32.mrf.mxu1 }
 0x243   :  { %1195 = vrot.lane.b32.xlu1 %v1071_v56, %s1513_s0  ;;  %1235 = vrot.lane.b32.xlu2 %v1151_v33, %s1514_s16  ;;  %v1155_v1 = vmul.f32 %v2186_v55, %v1071_v56 }
 0x248   :  { %v1034_v25 = vpop.f32.mrf.mxu0  ;;  %v1105_v24 = vpop.f32.mrf.mxu2 }
 0x249   :  { %v1152_v42 = vmul.f32 %v2199_v3, %v1034_v25  ;;  %v1157_v46 = vmul.f32 %v2136_v50, %v1105_v24 }
 0x24b   :  { %1241 = vrot.lane.b32.xlu2 %v1154_v9, %s1514_s16  ;;  %1237 = vrot.lane.b32.xlu1 %v1152_v42, %s1514_s16  ;;  %v1145_v39 = vpop.f32.mrf.mxu3 }
 0x24c   :  { %v1161_v5 = vmul.f32 %v2163_v48, %v1145_v39 }
 0x250   :  { %v1037_v17 = vpop.f32.mrf.mxu0  ;;  %v1108_v26 = vpop.f32.mrf.mxu2 }
 0x251   :  { %1191 = vrot.lane.b32.xlu0 %v1037_v17, %s1513_s0  ;;  %v1074_v14 = vpop.f32.mrf.mxu1  ;;  %v1153_v59 = vmul.f32 %v2211_v0, %v1037_v17  ;;  %v1158_v31 = vmul.f32 %v2231_v23, %v1108_v26 }
 0x252   :  { %v1156_v49 = vmul.f32 %v2222_v44, %v1074_v14 }
 0x253   :  { %1189 = vrot.lane.b32.xlu2 %v1034_v25, %s1513_s0  ;;  %1243 = vrot.lane.b32.xlu1 %v1155_v1, %s1514_s16 }
 0x256   :  { %v1148_v2 = vpop.f32.mrf.mxu3 }
 0x257   :  { %v1162_v61 = vmul.f32 %v2169_v47, %v1148_v2 }
 0x258   :  { %v1111_v22 = vpop.f32.mrf.mxu2 }
 0x259   :  { %1197 = vrot.lane.b32.xlu0 %v1074_v14, %s1513_s0  ;;  %v1159_v62 = vmul.f32 %v2238_v20, %v1111_v22 }
 0x25b   :  { %1199 = vrot.lane.b32.xlu2 %v1105_v24, %s1513_s0  ;;  %1201 = vrot.lane.b32.xlu1 %v1108_v26, %s1513_s0 }
 0x261   :  { %1239 = vrot.lane.b32.xlu0 %v1153_v59, %s1514_s16 }
 0x263   :  { %1205 = vrot.lane.b32.xlu2 %v1142_v57, %s1513_s0  ;;  %1207 = vrot.lane.b32.xlu1 %v1145_v39, %s1513_s0 }
 0x269   :  { %1245 = vrot.lane.b32.xlu0 %v1156_v49, %s1514_s16 }
 0x26b   :  { %1247 = vrot.lane.b32.xlu2 %v1157_v46, %s1514_s16  ;;  %1249 = vrot.lane.b32.xlu1 %v1158_v31, %s1514_s16 }
 0x271   :  { %1203 = vrot.lane.b32.xlu0 %v1111_v22, %s1513_s0 }
 0x273   :  { %1253 = vrot.lane.b32.xlu2 %v1160_v32, %s1514_s16  ;;  %1255 = vrot.lane.b32.xlu1 %v1161_v5, %s1514_s16 }
 0x279   :  { %1209 = vrot.lane.b32.xlu0 %v1148_v2, %s1513_s0 }
 0x27b   :  { %1301 = vrot.lane.b32.xlu2 %v1172_v27, %s1512_s9  ;;  %1303 = vrot.lane.b32.xlu1 %v1173_v19, %s1512_s9 }
 0x281   :  { %1251 = vrot.lane.b32.xlu0 %v1159_v62, %s1514_s16 }
 0x289   :  { %1257 = vrot.lane.b32.xlu0 %v1162_v61, %s1514_s16 }
 0x291   :  { %1305 = vrot.lane.b32.xlu0 %v1174_v8, %s1512_s9 }
 0x295   :  { %v1194_v35 = vpop.permute.xlu2 %1193 }
 0x296   :  { %v1322_v12 = vsel %vm61_vm0, %v2180_v60, %v1194_v35  ;;  %v1294_v60 = vpop.permute.xlu0 %1293 }
 0x29d   :  { %v1236_v54 = vpop.permute.xlu2 %1235 }
 0x29e   :  { %v1300_v29 = vpop.permute.xlu0 %1299 }
 0x2a5   :  { %v1242_v13 = vpop.permute.xlu2 %1241 }
 0x2a6   :  { %v1335_v37 = vsel %vm1331_vm5, %v1322_v12, %v1242_v13 }
 0x2a7   :  { %v1348_v51 = vsel %vm1344_vm14, %v1335_v37, %v1290_v43 }
 0x2a8   :  { %1360 = vst [vmem:[%s2619_s4 + $0x18] sm:$0xff] %v1348_v51 }
 0x2ac   :  { %v1188_v28 = vpop.permute.xlu1 %1187 }
 0x2ad   :  { %v1319_v16 = vsel %vm61_vm0, %v2205_v63, %v1188_v28  ;;  %v1190_v30 = vpop.permute.xlu2 %1189 }
 0x2ae   :  { %v1332_v7 = vsel %vm1331_vm5, %v1319_v16, %v1236_v54  ;;  %v1320_v33 = vsel %vm61_vm0, %v2199_v3, %v1190_v30 }
 0x2af   :  { %v1345_v34 = vsel %vm1344_vm14, %v1332_v7, %v1284_v52 }
 0x2b0   :  { %1357 = vst [vmem:[%s2619_s4] sm:$0xff] %v1345_v34 }
 0x2b5   :  { %v1196_v21 = vpop.permute.xlu1 %1195  ;;  %v1200_v10 = vpop.permute.xlu2 %1199 }
 0x2b6   :  { %v1323_v17 = vsel %vm61_vm0, %v2186_v55, %v1196_v21  ;;  %v1325_v24 = vsel %vm61_vm0, %v2136_v50, %v1200_v10 }
 0x2bd   :  { %v1206_v56 = vpop.permute.xlu2 %1205  ;;  %v1238_v25 = vpop.permute.xlu1 %1237 }
 0x2be   :  { %v1333_v63 = vsel %vm1331_vm5, %v1320_v33, %v1238_v25  ;;  %v1328_v46 = vsel %vm61_vm0, %v2157_v18, %v1206_v56 }
 0x2bf   :  { %v1346_v42 = vsel %vm1344_vm14, %v1333_v63, %v1286_v40 }
 0x2c0   :  { %1358 = vst [vmem:[%s2619_s4 + $0x8] sm:$0xff] %v1346_v42 }
 0x2c3   :  { %v1192_v9 = vpop.permute.xlu0 %1191 }
 0x2c4   :  { %v1321_v39 = vsel %vm61_vm0, %v2211_v0, %v1192_v9 }
 0x2c5   :  { %v1248_v1 = vpop.permute.xlu2 %1247  ;;  %v1244_v14 = vpop.permute.xlu1 %1243 }
 0x2c6   :  { %v1338_v3 = vsel %vm1331_vm5, %v1325_v24, %v1248_v1  ;;  %v1336_v57 = vsel %vm1331_vm5, %v1323_v17, %v1244_v14 }
 0x2c7   :  { %v1351_v26 = vsel %vm1344_vm14, %v1338_v3, %v1296_v6  ;;  %v1349_v59 = vsel %vm1344_vm14, %v1336_v57, %v1292_v15 }
 0x2c8   :  { %1363 = vst [vmem:[%s2619_s4 + $0x30] sm:$0xff] %v1351_v26 }
 0x2c9   :  { %1361 = vst [vmem:[%s2619_s4 + $0x20] sm:$0xff] %v1349_v59 }
 0x2cb   :  { %v1198_v55 = vpop.permute.xlu0 %1197 }
 0x2cc   :  { %v1324_v0 = vsel %vm61_vm0, %v2222_v44, %v1198_v55 }
 0x2cd   :  { %v1254_v50 = vpop.permute.xlu2 %1253  ;;  %v1202_v41 = vpop.permute.xlu1 %1201 }
 0x2ce   :  { %v1341_v36 = vsel %vm1331_vm5, %v1328_v46, %v1254_v50  ;;  %v1326_v58 = vsel %vm61_vm0, %v2231_v23, %v1202_v41 }
 0x2d3   :  { %v1240_v53 = vpop.permute.xlu0 %1239 }
 0x2d4   :  { %v1334_v49 = vsel %vm1331_vm5, %v1321_v39, %v1240_v53 }
 0x2d5   :  { %v1347_v31 = vsel %vm1344_vm14, %v1334_v49, %v1288_v11  ;;  %v1302_v4 = vpop.permute.xlu2 %1301  ;;  %v1208_v22 = vpop.permute.xlu1 %1207 }
 0x2d6   :  { %1359 = vst [vmem:[%s2619_s4 + $0x10] sm:$0xf] %v1347_v31  ;;  %v1354_v32 = vsel %vm1344_vm14, %v1341_v36, %v1302_v4  ;;  %v1329_v43 = vsel %vm61_vm0, %v2163_v48, %v1208_v22 }
 0x2d7   :  { %1366 = vst [vmem:[%s2619_s4 + $0x48] sm:$0xff] %v1354_v32 }
 0x2db   :  { %v1246_v18 = vpop.permute.xlu0 %1245 }
 0x2dc   :  { %v1337_v5 = vsel %vm1331_vm5, %v1324_v0, %v1246_v18 }
 0x2dd   :  { %v1350_v45 = vsel %vm1344_vm14, %v1337_v5, %v1294_v60  ;;  %v1250_v2 = vpop.permute.xlu1 %1249 }
 0x2de   :  { %1362 = vst [vmem:[%s2619_s4 + $0x28] sm:$0xf] %v1350_v45  ;;  %v1339_v52 = vsel %vm1331_vm5, %v1326_v58, %v1250_v2 }
 0x2df   :  { %v1352_v27 = vsel %vm1344_vm14, %v1339_v52, %v1298_v38 }
 0x2e0   :  { %1364 = vst [vmem:[%s2619_s4 + $0x38] sm:$0xff] %v1352_v27 }
 0x2e3   :  { %v1204_v44 = vpop.permute.xlu0 %1203 }
 0x2e4   :  { %v1327_v8 = vsel %vm61_vm0, %v2238_v20, %v1204_v44 }
 0x2e5   :  { %v1256_v19 = vpop.permute.xlu1 %1255 }
 0x2e6   :  { %v1342_v23 = vsel %vm1331_vm5, %v1329_v43, %v1256_v19 }
 0x2eb   :  { %v1210_v62 = vpop.permute.xlu0 %1209 }
 0x2ec   :  { %v1330_v54 = vsel %vm61_vm0, %v2169_v47, %v1210_v62 }
 0x2ed   :  { %v1304_v61 = vpop.permute.xlu1 %1303 }
 0x2ee   :  { %v1355_v6 = vsel %vm1344_vm14, %v1342_v23, %v1304_v61 }
 0x2ef   :  { %1367 = vst [vmem:[%s2619_s4 + $0x50] sm:$0xff] %v1355_v6 }
 0x2f3   :  { %v1252_v40 = vpop.permute.xlu0 %1251 }
 0x2f4   :  { %v1340_v35 = vsel %vm1331_vm5, %v1327_v8, %v1252_v40 }
 0x2f5   :  { %v1353_v15 = vsel %vm1344_vm14, %v1340_v35, %v1300_v29 }
 0x2f6   :  { %1365 = vst [vmem:[%s2619_s4 + $0x40] sm:$0xf] %v1353_v15 }
 0x2fb   :  { %v1258_v48 = vpop.permute.xlu0 %1257 }
 0x2fc   :  { %v1343_v38 = vsel %vm1331_vm5, %v1330_v54, %v1258_v48 }
 0x303   :  { %v1306_v12 = vpop.permute.xlu0 %1305 }
 0x304   :  { %v1356_v13 = vsel %vm1344_vm14, %v1343_v38, %v1306_v12 }
 0x305   :  { %1368 = vst [vmem:[%s2619_s4 + $0x58] sm:$0xf] %v1356_v13 }

</bundles_post_ra>
